<compile_context>
chip_gen: v7x
topology: tpu7x:2x2x1
jax: 0.10.0
libtpu: 0.0.40
codegen_flags: <defaults>
</compile_context>

<pallas_src>
import functools

import numpy as np
import jax
import jax.numpy as jnp
from jax.experimental import pallas as pl
from jax.experimental.pallas import tpu as pltpu


# ----------------------------------------------------------------------------
# In-kernel building blocks
# ----------------------------------------------------------------------------

def _leaky(x, slope=0.2):
    return jnp.where(x > 0, x, slope * x)


def _conv_matmul(x, w_bf16, b_f32, *, K, pad_l, pad_r, lane_group):
    """Conv along the "time" axis of a batch-interleaved activation.

    x       : (C, T*g) f32, column = t*g + b_local   (g = lane_group = batch tile)
    w_bf16  : (Cout, K*C) bf16, column = k*C + c ; tap k reads time offset k - pad_l
    b_f32   : (Cout, 1) f32 or None
    returns : (Cout, T_out*g) f32 with T_out = T + pad_l + pad_r - K + 1
    """
    C, n_cols = x.shape
    g = lane_group
    parts = []
    if pad_l:
        parts.append(jnp.zeros((C, pad_l * g), x.dtype))
    parts.append(x)
    if pad_r:
        parts.append(jnp.zeros((C, pad_r * g), x.dtype))
    x_pad = jnp.concatenate(parts, axis=1) if len(parts) > 1 else x
    n_out = n_cols + (pad_l + pad_r - K + 1) * g
    cols = jnp.concatenate(
        [x_pad[:, k * g:k * g + n_out] for k in range(K)], axis=0
    ).astype(jnp.bfloat16)                                  # (K*C, n_out) bf16 MXU operand
    z = jnp.dot(w_bf16, cols, preferred_element_type=jnp.float32)
    if b_f32 is not None:
        z = z + b_f32
    return z


def _fused_kernel(x_ref, *refs, n_up, first_K, fb_K, fb_pad_l, fb_pad_r, b_tile):
    # refs = (w0, b0, w1_fold, b1_fold, ..., wfb_fold, o_ref)
    o_ref = refs[-1]
    wfb_ref = refs[-2]
    wb = refs[:-2]

    x = x_ref[0]                                            # (C0, (T0+2*pad0)*b_tile) f32

    # Layer 0: Conv1d(k=7) + LeakyReLU (input halo pre-padded in the wrapper).
    z = _conv_matmul(x, wb[0][...], wb[1][...],
                     K=first_K, pad_l=0, pad_r=0, lane_group=b_tile)
    x = _leaky(z)

    # Upsample stack, kept in polyphase layout: rows = phase*Cout + co, columns stay
    # T0*b_tile. Phase->time mapping is folded into the (next layer's) weights, so no
    # interleave is ever done in-kernel.
    for i in range(n_up):
        z = _conv_matmul(x, wb[2 * (i + 1)][...], wb[2 * (i + 1) + 1][...],
                         K=3, pad_l=1, pad_r=1, lane_group=b_tile)
        x = _leaky(z)

    # F.pad(x,(0,1)) + filter-bank transposed convolve, folded onto the polyphase layout.
    y = _conv_matmul(x, wfb_ref[...], None,
                     K=fb_K, pad_l=fb_pad_l, pad_r=fb_pad_r, lane_group=b_tile)
    o_ref[0] = y.astype(o_ref.dtype)                        # (P, T0*b_tile): dense (8,128)


# ----------------------------------------------------------------------------
# One-time, host-side weight folding (all flips / phase maps hoisted out of the kernel)
# ----------------------------------------------------------------------------

def _fold_upsample(w, b, s, P):
    """ConvTranspose1d(Cin->Cout, K=2s, stride=s, pad=s//2) folded onto a polyphase
    input with P phases (input rows = rho_in*Cin + ci; column q holds time q*P + rho_in).

    Returns W (P*s*Cout, 3*P*Cin) with row = rho_out*Cout + co, rho_out = rho_in*s + r,
    col = tap*(P*Cin) + rho*Cin + ci, tap in {0: q-1, 1: q, 2: q+1}; and bias (P*s*Cout,1).
    """
    w = np.asarray(w, np.float32)
    b = np.asarray(b, np.float32)
    Cin, Cout, K = w.shape
    assert K == 2 * s and s % 2 == 0, "polyphase fold assumes kernel=2*s with even s"
    half = s // 2
    wt = np.transpose(w, (2, 1, 0))                         # (K, Cout, Cin)
    W = np.zeros((P * s * Cout, 3 * P * Cin), np.float32)
    for rho_in in range(P):
        for r in range(s):
            rho_out = rho_in * s + r
            taps = [(0, wt[r + half])]                      # coeff on y_in[Q]
            if r < half:
                taps.append((-1, wt[r + s + half]))         # coeff on y_in[Q-1]
            else:
                taps.append((1, wt[r - half]))              # coeff on y_in[Q+1]
            for delta, coef in taps:
                pos = rho_in + delta
                if pos < 0:
                    tap, rho = 0, P - 1
                elif pos >= P:
                    tap, rho = 2, 0
                else:
                    tap, rho = 1, pos
                r0 = rho_out * Cout
                c0 = tap * (P * Cin) + rho * Cin
                W[r0:r0 + Cout, c0:c0 + Cin] += coef
    bias = np.tile(b.reshape(1, Cout), (P * s, 1)).reshape(P * s * Cout, 1)
    return W, bias


def _fold_filter_bank(filter_bank, P):
    """F.pad(x,(0,1)) + conv_transpose1d(x, fb, stride=1, pad=Kfb//2) folded onto the
    P-phase polyphase layout (input rows = rho*C + c).

    Returns (W, K_q, pad_l_q, pad_r_q): W is (P, K_q*P*C), row = rho_out (output time
    tau = q*P + rho_out), col = k*(P*C) + rho_in*C + c; tap k reads column q + k - pad_l_q.
    """
    fb = np.asarray(filter_bank, np.float32)
    C, _, Kfb = fb.shape
    w_conv = fb[:, 0, ::-1]                                 # flipped bank: conv weight (C, Kfb)
    pad_l = Kfb - 1 - Kfb // 2
    pad_r = pad_l + 1                                       # + the F.pad(x, (0, 1))
    assert pad_l + pad_r == Kfb - 1, "polyphase fb fold assumes an even fb kernel"
    # TODO(synk): odd filter-bank kernels change the output length and are not folded here.
    entries = []
    for rho_out in range(P):
        for k in range(Kfb):
            m = rho_out + k - pad_l
            entries.append((rho_out, m // P, m % P, k))
    d_min = min(d for _, d, _, _ in entries)
    d_max = max(d for _, d, _, _ in entries)
    K_q = d_max - d_min + 1
    W = np.zeros((P, K_q * P * C), np.float32)
    for rho_out, d, rho_in, k in entries:
        c0 = (d - d_min) * (P * C) + rho_in * C
        W[rho_out, c0:c0 + C] += w_conv[:, k]
    return W, K_q, -d_min, d_max


def prepare_params(params, filter_bank, scale_factors):
    """Flip/fold/reshape/cast all weights ONCE (host-side, outside jit)."""
    prepped = []
    w0, b0 = params[0]
    w0 = np.asarray(w0, np.float32)
    b0 = np.asarray(b0, np.float32)
    C1, C0, K0 = w0.shape
    w0p = np.transpose(w0, (0, 2, 1)).reshape(C1, K0 * C0)      # col = k*Cin + ci
    prepped += [jnp.asarray(w0p, jnp.bfloat16),
                jnp.asarray(b0.reshape(C1, 1), jnp.float32)]

    P = 1
    c_last = C1
    for i in range(1, len(scale_factors)):
        w, b = params[i]
        s = int(scale_factors[i])
        W, bias = _fold_upsample(w, b, s, P)
        prepped += [jnp.asarray(W, jnp.bfloat16), jnp.asarray(bias, jnp.float32)]
        P *= s
        c_last = np.asarray(w).shape[1]

    assert c_last == filter_bank.shape[0], "channels[-1] must equal the filter count"
    Wfb, fb_K, fb_pad_l, fb_pad_r = _fold_filter_bank(filter_bank, P)
    prepped.append(jnp.asarray(Wfb, jnp.bfloat16))

    meta = dict(first_K=K0, n_up=len(scale_factors) - 1, P=P,
                fb_K=fb_K, fb_pad_l=fb_pad_l, fb_pad_r=fb_pad_r)
    return tuple(prepped), meta


# ----------------------------------------------------------------------------
# Forward wrapper: one fused pallas_call over batch tiles
# ----------------------------------------------------------------------------

def filter_bank_channel_generator_forward(prepped, x, *, meta, b_tile):
    B, C0, T = x.shape
    assert B % b_tile == 0, "batch must be divisible by the batch tile"
    num_tiles = B // b_tile
    P = meta["P"]
    first_K = meta["first_K"]
    pad0 = first_K // 2
    N = T * b_tile

    # Fold batch onto the lane/N axis: column = t*b_tile + b_local; pre-pad the layer-0
    # halo once here so the kernel's first layer does no concat.
    x_r = x.reshape(num_tiles, b_tile, C0, T)
    x_r = jnp.transpose(x_r, (0, 2, 3, 1)).reshape(num_tiles, C0, N)
    x_r = jnp.pad(x_r, ((0, 0), (0, 0), (pad0 * b_tile, pad0 * b_tile)))

    kernel = functools.partial(
        _fused_kernel, n_up=meta["n_up"], first_K=first_K, fb_K=meta["fb_K"],
        fb_pad_l=meta["fb_pad_l"], fb_pad_r=meta["fb_pad_r"], b_tile=b_tile)

    in_specs = [pl.BlockSpec((1, C0, N + 2 * pad0 * b_tile), lambda bi: (bi, 0, 0))]
    in_specs += [pl.BlockSpec(p.shape, lambda bi: (0, 0)) for p in prepped]

    out = pl.pallas_call(
        kernel,
        out_shape=jax.ShapeDtypeStruct((num_tiles, P, N), jnp.float32),
        grid_spec=pltpu.PrefetchScalarGridSpec(
            num_scalar_prefetch=0,
            grid=(num_tiles,),
            in_specs=in_specs,
            out_specs=pl.BlockSpec((1, P, N), lambda bi: (bi, 0, 0)),
        ),
        compiler_params=pltpu.CompilerParams(
            dimension_semantics=("parallel",),
            vmem_limit_bytes=32 * 1024 * 1024),
    )(x_r, *prepped)

    # Polyphase -> time (tiny, wrapper-side): [bi, rho, q*b_tile + b] is sample
    # bi*b_tile + b at time q*P + rho.
    out = out.reshape(num_tiles, P, T, b_tile)
    out = jnp.transpose(out, (0, 3, 2, 1)).reshape(B, 1, T * P)
    return out


# ----------------------------------------------------------------------------
# Pure-JAX f32 layer-by-layer reference (used only to validate the fused kernel)
# ----------------------------------------------------------------------------

def reference_forward(params, filter_bank, x, scale_factors):
    dn = ('NCH', 'OIH', 'NCH')
    hp = jax.lax.Precision.HIGHEST
    w0, b0 = params[0]
    y = jax.lax.conv_general_dilated(x, w0, (1,), [(3, 3)],
                                     dimension_numbers=dn, precision=hp)
    y = y + b0[None, :, None]
    y = jnp.where(y > 0, y, 0.2 * y)
    for i in range(1, len(scale_factors)):
        w, b = params[i]                                   # (Cin, Cout, K) conv-transpose weight
        s = int(scale_factors[i])
        K = 2 * s
        pad = s // 2
        w_conv = jnp.flip(w, axis=-1).transpose(1, 0, 2)   # (Cout, Cin, K)
        y = jax.lax.conv_general_dilated(y, w_conv, (1,), [(K - 1 - pad, K - 1 - pad)],
                                         lhs_dilation=(s,), dimension_numbers=dn,
                                         precision=hp)
        y = y + b[None, :, None]
        y = jnp.where(y > 0, y, 0.2 * y)
    y = jnp.pad(y, ((0, 0), (0, 0), (0, 1)))
    Kfb = filter_bank.shape[-1]
    fb_conv = jnp.flip(filter_bank, axis=-1).transpose(1, 0, 2)   # (1, n_filt, Kfb)
    y = jax.lax.conv_general_dilated(y, fb_conv, (1,),
                                     [(Kfb - 1 - Kfb // 2, Kfb - 1 - Kfb // 2)],
                                     dimension_numbers=dn, precision=hp)
    return y


# ----------------------------------------------------------------------------
# Deterministic parameter / input construction (PyTorch-like init)
# ----------------------------------------------------------------------------

def init_params(key, scale_factors, channels):
    params = []
    keys = jax.random.split(key, 2 * len(scale_factors))
    for i in range(len(scale_factors)):
        kw, kb = keys[2 * i], keys[2 * i + 1]
        if i == 0:
            shape_w = (channels[1], channels[0], 7)            # Conv1d (Cout, Cin, K)
            fan_in = channels[0] * 7
        else:
            s = int(scale_factors[i])
            shape_w = (channels[i], channels[i + 1], 2 * s)    # ConvTranspose1d (Cin, Cout, K)
            fan_in = channels[i] * 2 * s
        bound = 1.0 / float(np.sqrt(fan_in))
        w = jax.random.uniform(kw, shape_w, jnp.float32, -bound, bound)
        b = jax.random.uniform(kb, (channels[i + 1],), jnp.float32, -bound, bound)
        params.append((w, b))
    return params


def make_filter_bank(n_filters, kernel_size):
    # TODO(synk): zounds' FrequencyScale/FilterBank construction is not reproduced; a
    # deterministic synthetic bank (windowed sinusoids, unit L2 norm) stands in for it.
    t = jnp.arange(kernel_size, dtype=jnp.float32)
    window = 0.5 - 0.5 * jnp.cos(2 * jnp.pi * (t + 0.5) / kernel_size)
    freqs = (jnp.arange(n_filters, dtype=jnp.float32) + 1.0) / (2.0 * n_filters)
    bank = jnp.sin(2 * jnp.pi * freqs[:, None] * t[None, :]) * window[None, :]
    bank = bank / (jnp.linalg.norm(bank, axis=-1, keepdims=True) + 1e-8)
    return bank.reshape(n_filters, 1, kernel_size)             # (n_filters, 1, Kfb)


if __name__ == "__main__":
    key = jax.random.PRNGKey(0)
    k_param, k_x = jax.random.split(key)

    scale_factors = (1, 2, 4)            # total upsample = 8
    channels = (8, 16, 16, 32)           # channels[-1] == number of filter-bank filters
    B, T = 16, 16
    B_TILE = 8                           # layer-0 matmul N = 128; grid of 2 keeps both v7x
                                         # TensorCores busy (use 16 for 256-wide N on v6e)
    n_filters = channels[-1]
    fb_kernel_size = 16

    params = init_params(k_param, scale_factors, channels)
    filter_bank = make_filter_bank(n_filters, fb_kernel_size)
    prepped, meta = prepare_params(params, filter_bank, scale_factors)   # once, host-side
    x = jax.random.normal(k_x, (B, channels[0], T), jnp.float32)         # (16, 8, 16)

    fwd = jax.jit(functools.partial(filter_bank_channel_generator_forward,
                                    meta=meta, b_tile=B_TILE))
    y = fwd(prepped, x)
    jax.block_until_ready(y)

    P = meta["P"]
    assert y.shape == (B, 1, T * P), y.shape            # (16, 1, 128)

    # Validate the fused / folded kernel against the f32 layer-by-layer reference
    # (difference budget: bf16 matmul operands with f32 accumulation).
    y_ref = reference_forward(params, filter_bank, x, scale_factors)
    err = float(jnp.max(jnp.abs(y - y_ref)))
    scale = float(jnp.max(jnp.abs(y_ref)))
    assert err <= 0.05 * scale + 1e-3, (err, scale)

    print("KERNEL_OK")
</pallas_src>

<mosaic_0001>
module attributes {stable_mosaic.version = 11 : i64} {
  func.func @_fused_kernel(%arg0: i32, %arg1: memref<1x8x176xf32, #tpu.memory_space<vmem>>, %arg2: memref<16x56xbf16, #tpu.memory_space<vmem>>, %arg3: memref<16x1xf32, #tpu.memory_space<vmem>>, %arg4: memref<32x48xbf16, #tpu.memory_space<vmem>>, %arg5: memref<32x1xf32, #tpu.memory_space<vmem>>, %arg6: memref<256x96xbf16, #tpu.memory_space<vmem>>, %arg7: memref<256x1xf32, #tpu.memory_space<vmem>>, %arg8: memref<8x768xbf16, #tpu.memory_space<vmem>>, %arg9: memref<1x8x128xf32, #tpu.memory_space<vmem>>) attributes {dimension_semantics = [#tpu.dimension_semantics<parallel>], iteration_bounds = array<i64: 2>, scalar_prefetch = 0 : i64, scratch_operands = 0 : i64, tpu.core_type = #tpu.core_type<tc>, window_params = [{transform_indices = @transform_0, window_bounds = array<i64: 1, 8, 176>}, {pipeline_mode = #tpu.pipeline_mode<synchronous>, transform_indices = @transform_1, window_bounds = array<i64: 16, 56>}, {pipeline_mode = #tpu.pipeline_mode<synchronous>, transform_indices = @transform_2, window_bounds = array<i64: 16, 1>}, {pipeline_mode = #tpu.pipeline_mode<synchronous>, transform_indices = @transform_3, window_bounds = array<i64: 32, 48>}, {pipeline_mode = #tpu.pipeline_mode<synchronous>, transform_indices = @transform_4, window_bounds = array<i64: 32, 1>}, {pipeline_mode = #tpu.pipeline_mode<synchronous>, transform_indices = @transform_5, window_bounds = array<i64: 256, 96>}, {pipeline_mode = #tpu.pipeline_mode<synchronous>, transform_indices = @transform_6, window_bounds = array<i64: 256, 1>}, {pipeline_mode = #tpu.pipeline_mode<synchronous>, transform_indices = @transform_7, window_bounds = array<i64: 8, 768>}, {transform_indices = @transform_8, window_bounds = array<i64: 1, 8, 128>}]} {
    %c0 = arith.constant 0 : index
    %c0_0 = arith.constant 0 : index
    %c0_1 = arith.constant 0 : index
    %0 = vector.load %arg1[%c0, %c0_0, %c0_1] : memref<1x8x176xf32, #tpu.memory_space<vmem>>, vector<1x8x176xf32>
    %1 = vector.shape_cast %0 : vector<1x8x176xf32> to vector<8x176xf32>
    %c0_2 = arith.constant 0 : index
    %c0_3 = arith.constant 0 : index
    %2 = vector.load %arg2[%c0_2, %c0_3] : memref<16x56xbf16, #tpu.memory_space<vmem>>, vector<16x56xbf16>
    %c0_4 = arith.constant 0 : index
    %c0_5 = arith.constant 0 : index
    %3 = vector.load %arg3[%c0_4, %c0_5] : memref<16x1xf32, #tpu.memory_space<vmem>>, vector<16x1xf32>
    %4 = vector.extract_strided_slice %1 {offsets = [0, 0], sizes = [8, 128], strides = [1, 1]} : vector<8x176xf32> to vector<8x128xf32>
    %5 = vector.extract_strided_slice %1 {offsets = [0, 8], sizes = [8, 128], strides = [1, 1]} : vector<8x176xf32> to vector<8x128xf32>
    %6 = vector.extract_strided_slice %1 {offsets = [0, 16], sizes = [8, 128], strides = [1, 1]} : vector<8x176xf32> to vector<8x128xf32>
    %7 = vector.extract_strided_slice %1 {offsets = [0, 24], sizes = [8, 128], strides = [1, 1]} : vector<8x176xf32> to vector<8x128xf32>
    %8 = vector.extract_strided_slice %1 {offsets = [0, 32], sizes = [8, 128], strides = [1, 1]} : vector<8x176xf32> to vector<8x128xf32>
    %9 = vector.extract_strided_slice %1 {offsets = [0, 40], sizes = [8, 128], strides = [1, 1]} : vector<8x176xf32> to vector<8x128xf32>
    %10 = vector.extract_strided_slice %1 {offsets = [0, 48], sizes = [8, 128], strides = [1, 1]} : vector<8x176xf32> to vector<8x128xf32>
    %11 = tpu.concatenate %4, %5, %6, %7, %8, %9, %10 in 0 : vector<8x128xf32>, vector<8x128xf32>, vector<8x128xf32>, vector<8x128xf32>, vector<8x128xf32>, vector<8x128xf32>, vector<8x128xf32> -> vector<56x128xf32>
    %12 = arith.truncf %11 : vector<56x128xf32> to vector<56x128xbf16>
    %cst = arith.constant dense<0.000000e+00> : vector<16x128xf32>
    %13 = tpu.matmul %2, %12, %cst {dimension_numbers = #tpu.dot_dimension_numbers<[1], [0], [0], [1], [0, 0, 1, 1], [], []>} : vector<16x56xbf16>, vector<56x128xbf16>, vector<16x128xf32> -> vector<16x128xf32>
    %14 = vector.broadcast %3 : vector<16x1xf32> to vector<16x128xf32>
    %15 = arith.addf %13, %14 : vector<16x128xf32>
    %cst_6 = arith.constant 0.000000e+00 : f32
    %16 = vector.broadcast %cst_6 : f32 to vector<16x128xf32>
    %17 = arith.cmpf ogt, %15, %16 : vector<16x128xf32>
    %cst_7 = arith.constant 2.000000e-01 : f32
    %18 = vector.broadcast %cst_7 : f32 to vector<16x128xf32>
    %19 = arith.mulf %18, %15 : vector<16x128xf32>
    %20 = arith.select %17, %15, %19 : vector<16x128xi1>, vector<16x128xf32>
    %c0_8 = arith.constant 0 : index
    %c0_9 = arith.constant 0 : index
    %21 = vector.load %arg4[%c0_8, %c0_9] : memref<32x48xbf16, #tpu.memory_space<vmem>>, vector<32x48xbf16>
    %c0_10 = arith.constant 0 : index
    %c0_11 = arith.constant 0 : index
    %22 = vector.load %arg5[%c0_10, %c0_11] : memref<32x1xf32, #tpu.memory_space<vmem>>, vector<32x1xf32>
    %cst_12 = arith.constant 0.000000e+00 : f32
    %23 = vector.broadcast %cst_12 : f32 to vector<16x8xf32>
    %cst_13 = arith.constant 0.000000e+00 : f32
    %24 = vector.broadcast %cst_13 : f32 to vector<16x8xf32>
    %25 = tpu.concatenate %23, %20, %24 in 1 : vector<16x8xf32>, vector<16x128xf32>, vector<16x8xf32> -> vector<16x144xf32>
    %26 = vector.extract_strided_slice %25 {offsets = [0, 0], sizes = [16, 128], strides = [1, 1]} : vector<16x144xf32> to vector<16x128xf32>
    %27 = vector.extract_strided_slice %25 {offsets = [0, 8], sizes = [16, 128], strides = [1, 1]} : vector<16x144xf32> to vector<16x128xf32>
    %28 = vector.extract_strided_slice %25 {offsets = [0, 16], sizes = [16, 128], strides = [1, 1]} : vector<16x144xf32> to vector<16x128xf32>
    %29 = tpu.concatenate %26, %27, %28 in 0 : vector<16x128xf32>, vector<16x128xf32>, vector<16x128xf32> -> vector<48x128xf32>
    %30 = arith.truncf %29 : vector<48x128xf32> to vector<48x128xbf16>
    %cst_14 = arith.constant dense<0.000000e+00> : vector<32x128xf32>
    %31 = tpu.matmul %21, %30, %cst_14 {dimension_numbers = #tpu.dot_dimension_numbers<[1], [0], [0], [1], [0, 0, 1, 1], [], []>} : vector<32x48xbf16>, vector<48x128xbf16>, vector<32x128xf32> -> vector<32x128xf32>
    %32 = vector.broadcast %22 : vector<32x1xf32> to vector<32x128xf32>
    %33 = arith.addf %31, %32 : vector<32x128xf32>
    %cst_15 = arith.constant 0.000000e+00 : f32
    %34 = vector.broadcast %cst_15 : f32 to vector<32x128xf32>
    %35 = arith.cmpf ogt, %33, %34 : vector<32x128xf32>
    %cst_16 = arith.constant 2.000000e-01 : f32
    %36 = vector.broadcast %cst_16 : f32 to vector<32x128xf32>
    %37 = arith.mulf %36, %33 : vector<32x128xf32>
    %38 = arith.select %35, %33, %37 : vector<32x128xi1>, vector<32x128xf32>
    %c0_17 = arith.constant 0 : index
    %c0_18 = arith.constant 0 : index
    %39 = vector.load %arg6[%c0_17, %c0_18] : memref<256x96xbf16, #tpu.memory_space<vmem>>, vector<256x96xbf16>
    %c0_19 = arith.constant 0 : index
    %c0_20 = arith.constant 0 : index
    %40 = vector.load %arg7[%c0_19, %c0_20] : memref<256x1xf32, #tpu.memory_space<vmem>>, vector<256x1xf32>
    %cst_21 = arith.constant 0.000000e+00 : f32
    %41 = vector.broadcast %cst_21 : f32 to vector<32x8xf32>
    %cst_22 = arith.constant 0.000000e+00 : f32
    %42 = vector.broadcast %cst_22 : f32 to vector<32x8xf32>
    %43 = tpu.concatenate %41, %38, %42 in 1 : vector<32x8xf32>, vector<32x128xf32>, vector<32x8xf32> -> vector<32x144xf32>
    %44 = vector.extract_strided_slice %43 {offsets = [0, 0], sizes = [32, 128], strides = [1, 1]} : vector<32x144xf32> to vector<32x128xf32>
    %45 = vector.extract_strided_slice %43 {offsets = [0, 8], sizes = [32, 128], strides = [1, 1]} : vector<32x144xf32> to vector<32x128xf32>
    %46 = vector.extract_strided_slice %43 {offsets = [0, 16], sizes = [32, 128], strides = [1, 1]} : vector<32x144xf32> to vector<32x128xf32>
    %47 = tpu.concatenate %44, %45, %46 in 0 : vector<32x128xf32>, vector<32x128xf32>, vector<32x128xf32> -> vector<96x128xf32>
    %48 = arith.truncf %47 : vector<96x128xf32> to vector<96x128xbf16>
    %cst_23 = arith.constant dense<0.000000e+00> : vector<256x128xf32>
    %49 = tpu.matmul %39, %48, %cst_23 {dimension_numbers = #tpu.dot_dimension_numbers<[1], [0], [0], [1], [0, 0, 1, 1], [], []>} : vector<256x96xbf16>, vector<96x128xbf16>, vector<256x128xf32> -> vector<256x128xf32>
    %50 = vector.broadcast %40 : vector<256x1xf32> to vector<256x128xf32>
    %51 = arith.addf %49, %50 : vector<256x128xf32>
    %cst_24 = arith.constant 0.000000e+00 : f32
    %52 = vector.broadcast %cst_24 : f32 to vector<256x128xf32>
    %53 = arith.cmpf ogt, %51, %52 : vector<256x128xf32>
    %cst_25 = arith.constant 2.000000e-01 : f32
    %54 = vector.broadcast %cst_25 : f32 to vector<256x128xf32>
    %55 = arith.mulf %54, %51 : vector<256x128xf32>
    %56 = arith.select %53, %51, %55 : vector<256x128xi1>, vector<256x128xf32>
    %c0_26 = arith.constant 0 : index
    %c0_27 = arith.constant 0 : index
    %57 = vector.load %arg8[%c0_26, %c0_27] : memref<8x768xbf16, #tpu.memory_space<vmem>>, vector<8x768xbf16>
    %cst_28 = arith.constant 0.000000e+00 : f32
    %58 = vector.broadcast %cst_28 : f32 to vector<256x8xf32>
    %cst_29 = arith.constant 0.000000e+00 : f32
    %59 = vector.broadcast %cst_29 : f32 to vector<256x8xf32>
    %60 = tpu.concatenate %58, %56, %59 in 1 : vector<256x8xf32>, vector<256x128xf32>, vector<256x8xf32> -> vector<256x144xf32>
    %61 = vector.extract_strided_slice %60 {offsets = [0, 0], sizes = [256, 128], strides = [1, 1]} : vector<256x144xf32> to vector<256x128xf32>
    %62 = vector.extract_strided_slice %60 {offsets = [0, 8], sizes = [256, 128], strides = [1, 1]} : vector<256x144xf32> to vector<256x128xf32>
    %63 = vector.extract_strided_slice %60 {offsets = [0, 16], sizes = [256, 128], strides = [1, 1]} : vector<256x144xf32> to vector<256x128xf32>
    %64 = tpu.concatenate %61, %62, %63 in 0 : vector<256x128xf32>, vector<256x128xf32>, vector<256x128xf32> -> vector<768x128xf32>
    %65 = arith.truncf %64 : vector<768x128xf32> to vector<768x128xbf16>
    %cst_30 = arith.constant dense<0.000000e+00> : vector<8x128xf32>
    %66 = tpu.matmul %57, %65, %cst_30 {dimension_numbers = #tpu.dot_dimension_numbers<[1], [0], [0], [1], [0, 0, 1, 1], [], []>} : vector<8x768xbf16>, vector<768x128xbf16>, vector<8x128xf32> -> vector<8x128xf32>
    %c0_31 = arith.constant 0 : index
    %c0_32 = arith.constant 0 : index
    %c0_33 = arith.constant 0 : index
    %67 = vector.load %arg9[%c0_31, %c0_32, %c0_33] : memref<1x8x128xf32, #tpu.memory_space<vmem>>, vector<1x8x128xf32>
    %68 = vector.shape_cast %67 : vector<1x8x128xf32> to vector<8x128xf32>
    %69 = vector.shape_cast %66 : vector<8x128xf32> to vector<1x8x128xf32>
    tpu.vector_store %arg9[%c0_31, %c0_32, %c0_33], %69 {strides = array<i32>} : memref<1x8x128xf32, #tpu.memory_space<vmem>>, vector<1x8x128xf32>,
    return
  }
  func.func @transform_0(%arg0: i32) -> (i32, i32, i32) {
    %c0_i32 = arith.constant 0 : i32
    %c0_i32_0 = arith.constant 0 : i32
    %c0_i32_1 = arith.constant 0 : i32
    return %arg0, %c0_i32, %c0_i32_0 : i32, i32, i32
  }
  func.func @transform_1(%arg0: i32) -> (i32, i32) {
    %c0_i32 = arith.constant 0 : i32
    %c0_i32_0 = arith.constant 0 : i32
    %c0_i32_1 = arith.constant 0 : i32
    return %c0_i32, %c0_i32_0 : i32, i32
  }
  func.func @transform_2(%arg0: i32) -> (i32, i32) {
    %c0_i32 = arith.constant 0 : i32
    %c0_i32_0 = arith.constant 0 : i32
    %c0_i32_1 = arith.constant 0 : i32
    return %c0_i32, %c0_i32_0 : i32, i32
  }
  func.func @transform_3(%arg0: i32) -> (i32, i32) {
    %c0_i32 = arith.constant 0 : i32
    %c0_i32_0 = arith.constant 0 : i32
    %c0_i32_1 = arith.constant 0 : i32
    return %c0_i32, %c0_i32_0 : i32, i32
  }
  func.func @transform_4(%arg0: i32) -> (i32, i32) {
    %c0_i32 = arith.constant 0 : i32
    %c0_i32_0 = arith.constant 0 : i32
    %c0_i32_1 = arith.constant 0 : i32
    return %c0_i32, %c0_i32_0 : i32, i32
  }
  func.func @transform_5(%arg0: i32) -> (i32, i32) {
    %c0_i32 = arith.constant 0 : i32
    %c0_i32_0 = arith.constant 0 : i32
    %c0_i32_1 = arith.constant 0 : i32
    return %c0_i32, %c0_i32_0 : i32, i32
  }
  func.func @transform_6(%arg0: i32) -> (i32, i32) {
    %c0_i32 = arith.constant 0 : i32
    %c0_i32_0 = arith.constant 0 : i32
    %c0_i32_1 = arith.constant 0 : i32
    return %c0_i32, %c0_i32_0 : i32, i32
  }
  func.func @transform_7(%arg0: i32) -> (i32, i32) {
    %c0_i32 = arith.constant 0 : i32
    %c0_i32_0 = arith.constant 0 : i32
    %c0_i32_1 = arith.constant 0 : i32
    return %c0_i32, %c0_i32_0 : i32, i32
  }
  func.func @transform_8(%arg0: i32) -> (i32, i32, i32) {
    %c0_i32 = arith.constant 0 : i32
    %c0_i32_0 = arith.constant 0 : i32
    %c0_i32_1 = arith.constant 0 : i32
    return %arg0, %c0_i32, %c0_i32_0 : i32, i32, i32
  }
}

</mosaic_0001>

<bundles_post_ra>
// kernel: filter_bank_channel_generator_forward.1
= control target key start
LH: loop header
LB: loop body
LE: loop exit
PB: predicated region body
PF: predicated region fallthrough
CT: control target
= control target key end

     0   :  { %s3087_s27 = smov 0   ;;  %s3960_s0 = inlined_call_operand.vmem [shape: f32[2,8,176], index: 0, kind: input, shape index: {}]   ;;  %s3961_s1 = inlined_call_operand.vmem [shape: bf16[16,56], index: 1, kind: input, shape index: {}]   ;;  %s3962_s2 = inlined_call_operand.vmem [shape: f32[16,1], index: 2, kind: input, shape index: {}]   ;;  %s3963_s3 = inlined_call_operand.vmem [shape: bf16[32,48], index: 3, kind: input, shape index: {}]   ;;  %s3964_s4 = inlined_call_operand.vmem [shape: f32[32,1], index: 4, kind: input, shape index: {}]   ;;  %s3965_s5 = inlined_call_operand.vmem [shape: bf16[256,96], index: 5, kind: input, shape index: {}]   ;;  %s3966_s6 = inlined_call_operand.vmem [shape: f32[256,1], index: 6, kind: input, shape index: {}]   ;;  %s3967_s7 = inlined_call_operand.vmem [shape: bf16[8,768], index: 7, kind: input, shape index: {}]   ;;  %s3968_s8 = inlined_call_operand.vmem [shape: f32[2,8,128], index: 8, kind: output, shape index: {}]  }
   0x1 LB: > { %s2160_s28 = sadd.s32 4294967295, %s3030_s27   ;;  %p2164_p0 = scmp.ge.s32.totalorder %s3030_s27, 1  ;;  %s3030_s27 = sphi %s3087_s27, %s18_s27  }
   0x2   : > { %p262_p1 = scmp.lt.s32.totalorder %s3030_s27, 3 }
   0x4   : > { %p263_p2 = pnand %p2164_p0, %p262_p1 }
   0x5   : > { %p295_p3 = scmp.lt.s32.totalorder (!%p263_p2), %s2160_s28, 1  ;;  %v3032_v0 = vmov (!%p263_p2), 0.0   ;;  %s3033_s11 = smov (!%p263_p2), 120   ;;  %vm3037_vm0 = vmmov (!%p263_p2), 0   ;;  %v309_v4 = vld [vmem:[%s3962_s2] sm:$0xff] (!%p263_p2)  ;;  %v310_v5 = vld [vmem:[%s3962_s2 + $0x8] sm:$0xff] (!%p263_p2) }
   0x6   : > { %266 = sbr.rel (%p263_p2) target bundleno = 1910 (0x776), region = 52  ;;  %2408 = vmatprep.subr.bf16.mxu0 (!%p263_p2), %v3032_v0  ;;  %s3034_s12 = smov (!%p263_p2), 104   ;;  %2416 = vmatprep.mubr.msk.bf16.mxu0 (!%p263_p2), %vm3037_vm0, %v3032_v0  ;;  %v3040_v6 = vmov (!%p263_p2), 0   ;;  %vm317_vm1 = vcmask (!%p263_p2), 982016   ;;  %vm331_vm2 = vcmask (!%p263_p2), 850944   ;;  %vm324_vm3 = vcmask (!%p263_p2), 916480  }
   0x7   : > { %s3035_s13 = smov (!%p263_p2), 112   ;;  %s3036_s14 = smov (!%p263_p2), 96   ;;  %2522 = vset.pattern.permute.xlu0 (!%p263_p2), %v3040_v6  ;;  %2523 = vset.pattern.permute.xlu1 (!%p263_p2), %v3040_v6  ;;  %vm338_vm4 = vcmask (!%p263_p2), 785408   ;;  %vm345_vm5 = vcmask (!%p263_p2), 719872   ;;  %vm352_vm6 = vcmask (!%p263_p2), 654336   ;;  %vm378_vm7 = vcmask (!%p263_p2), 1043456  }
   0x8   : > { %s3038_s19 = smov (!%p263_p2), 88   ;;  %s3039_s20 = smov (!%p263_p2), 80   ;;  %v2999_v36 = vld [vmem:[%s3961_s1] sm:$0xff] (!%p263_p2)   ;;  %vm374_vm8 = vcmask (!%p263_p2), 457728   ;;  %vm445_vm11 = vcmask (!%p263_p2), 64512   ;;  %vm511_vm14 = vcmask (!%p263_p2), 392192  }
   0x9   : > { %s3041_s23 = smov (!%p263_p2), 8   ;;  %vm2172_vm12 = vmneg (!%p263_p2), %vm445_vm11  ;;  %v3000_v60 = vld [vmem:[%s3963_s3] sm:$0xff] (!%p263_p2)   ;;  %v434_v62 = vld [vmem:[%s3964_s4 + $0x8] sm:$0xff] (!%p263_p2) }
   0xa   : > { %vm3122_vm13 = vmpackc.low (!%p263_p2), %vm2172_vm12, %vm2172_vm12  ;;  %v433_v63 = vld [vmem:[%s3964_s4] sm:$0xff] (!%p263_p2) }
   0xd   : > { %s3976_s28 = smov (!%p295_p3, %s2160_s28), 1 }
   0xe   : > { %s2309_s29 = sshll.u32 %s3976_s28, 4 }
   0xf   : > { %s299_s10 = scalar_lea.vmem %s3960_s0, %s2309_s29 }
  0x10   : > { %v305_v1 = vld [vmem:[%s299_s10] sm:$0xff]  ;;  %v306_v2 = vld [vmem:[%s299_s10 + $0x8] sm:$0xff] }
  0x11   : > { %v2492_v3 = vpack.i.bf16 %v306_v2, %v305_v1 }
  0x13   : > { %2493 = vrot.lane.b32.xlu0 %v2492_v3, %s3033_s11  ;;  %2503 = vrot.lane.b32.xlu1 %v2492_v3, %s3034_s12 }
  0x17   : > { %2498 = vrot.lane.b32.xlu0 %v2492_v3, %s3035_s13  ;;  %2508 = vrot.lane.b32.xlu1 %v2492_v3, %s3036_s14 }
  0x1b   : > { %2513 = vrot.lane.b32.xlu0 %v2492_v3, %s3038_s19  ;;  %2518 = vrot.lane.b32.xlu1 %v2492_v3, %s3039_s20 }
  0x1f   : > { %361 = vperm.xlu0 %2522, %v309_v4   ;;  %366 = vperm.xlu1 %2523, %v310_v5  }
  0x85   : > { %v2494_v7 = vpop.permute.xlu0 %2493  ;;  %v2504_v8 = vpop.permute.xlu1 %2503 }
  0x86   : > { %v2496_v9 = vunpack.i.h.bf16 %v2494_v7  ;;  %v2495_v10 = vunpack.i.l.bf16 %v2494_v7  ;;  %v2506_v11 = vunpack.i.h.bf16 %v2504_v8  ;;  %v2505_v12 = vunpack.i.l.bf16 %v2504_v8 }
  0x88   : > { %v318_v13 = vsel %vm317_vm1, %v2495_v10, %v2496_v9  ;;  %v332_v17 = vsel %vm331_vm2, %v2505_v12, %v2506_v11 }
  0x89   : > { %v2499_v14 = vpop.permute.xlu0 %2498  ;;  %v355_v15 = vpack.c.bf16 %v318_v13, %v305_v1  ;;  %v2509_v16 = vpop.permute.xlu1 %2508  ;;  %v435_v1 = vld [vmem:[%s3964_s4 + $0x10] sm:$0xff] }
  0x8a   : > { %v2501_v18 = vunpack.i.h.bf16 %v2499_v14  ;;  %v2500_v19 = vunpack.i.l.bf16 %v2499_v14  ;;  %v2511_v20 = vunpack.i.h.bf16 %v2509_v16  ;;  %v2510_v21 = vunpack.i.l.bf16 %v2509_v16 }
  0x8b   : > { %2409 = vmatpush3.bf16.msra.mxu0 %v355_v15 }
  0x8c   : > { %2410 = vmatprep.subr.bf16.mxu0 %v3032_v0  ;;  %v325_v22 = vsel %vm324_vm3, %v2500_v19, %v2501_v18  ;;  %v339_v26 = vsel %vm338_vm4, %v2510_v21, %v2511_v20  ;;  %v3001_v20 = vld [vmem:[%s3963_s3 + $0x8] sm:$0xff]  }
  0x8d   : > { %v2514_v23 = vpop.permute.xlu0 %2513  ;;  %v356_v24 = vpack.c.bf16 %v332_v17, %v325_v22  ;;  %v2519_v25 = vpop.permute.xlu1 %2518 }
  0x8e   : > { %v2516_v27 = vunpack.i.h.bf16 %v2514_v23  ;;  %v2515_v28 = vunpack.i.l.bf16 %v2514_v23  ;;  %v2521_v29 = vunpack.i.h.bf16 %v2519_v25  ;;  %v2520_v30 = vunpack.i.l.bf16 %v2519_v25 }
  0x8f   : > { %2411 = vmatpush3.bf16.msra.mxu0 %v356_v24 }
  0x90   : > { %2412 = vmatprep.subr.bf16.mxu0 %v3032_v0  ;;  %v346_v31 = vsel %vm345_vm5, %v2515_v28, %v2516_v27  ;;  %v353_v32 = vsel %vm352_vm6, %v2520_v30, %v2521_v29 }
  0x91   : > { %v357_v33 = vpack.c.bf16 %v346_v31, %v339_v26  ;;  %v358_v34 = vpack.c.bf16 %v353_v32, %v353_v32 }
  0x93   : > { %2413 = vmatpush3.bf16.msra.mxu0 %v357_v33  ;;  %v380_v35 = vsel %vm378_vm7, %v358_v34, 0 }
  0x94   : > { %2414 = vmatprep.subr.bf16.mxu0 %v3032_v0  ;;  %v436_v0 = vld [vmem:[%s3964_s4 + $0x18] sm:$0xff] }
  0x97   : > { %2415 = vmatpush3.bf16.msra.mxu0 %v380_v35 }
  0x9a   : > { %2417 = vmatmul.mubr.msk.bf16.vlgmr.msra.gmra.mrb[0].mxu0 %vm374_vm8, %v2999_v36 }
  0x9b   : > { %2426 = vmatprep.mubr.msk.bf16.mxu0 %vm511_vm14, %v3000_v60 }
  0x9e   : > { %v362_v37 = vpop.permute.xlu0 %361  ;;  %v367_v39 = vpop.permute.xlu1 %366 }
 0x16d   : > { %v416_v38 = vpop.f32.mrb[0].mxu0 }
 0x16e   : > { %v417_v40 = vadd.f32 %v416_v38, %v362_v37  ;;  %v2418_v41 = vpop.f32.mrb[1].mxu0 }
 0x16f   : > { %v419_v42 = vpop.f32.mrb[2].mxu0 }
 0x170   : > { %v425_v43 = vmul.f32 0.2, %v417_v40  ;;  %v420_v44 = vadd.f32 %v419_v42, %v367_v39  ;;  %v2419_v45 = vpop.f32.mrb[3].mxu0  ;;  %vm423_vm9 = vcmp.gt.f32.partialorder %v417_v40, 0.0 }
 0x172   : > { %vm424_vm10 = vcmp.gt.f32.partialorder %v420_v44, 0.0  ;;  %v426_v46 = vmul.f32 0.2, %v420_v44  ;;  %v427_v47 = vsel %vm423_vm9, %v417_v40, %v425_v43 }
 0x174   : > { %v428_v48 = vsel %vm424_vm10, %v420_v44, %v426_v46 }
 0x175   : > { %v2524_v49 = vpack.i.bf16 %v428_v48, %v427_v47 }
 0x177   : > { %2525 = vrot.lane.b32.xlu1 %v2524_v49, %s3041_s23 }
 0x1e9   : > { %v2526_v50 = vpop.permute.xlu1 %2525 }
 0x1ea   : > { %v2528_v51 = vunpack.i.h.bf16 %v2526_v50  ;;  %v2527_v52 = vunpack.i.l.bf16 %v2526_v50 }
 0x1ec   : > { %v2175_v54 = vpack.c.bf16 %v2528_v51, %v2527_v52  ;;  %v447_v55 = vsel %vm445_vm11, 0.0, %v2528_v51  ;;  %v449_v56 = vsel %vm445_vm11, %v2528_v51, 0.0  ;;  %v446_v57 = vsel %vm445_vm11, 0.0, %v2527_v52 }
 0x1ed   : > { %v2539_v58 = vpack.i.bf16 %v449_v56, %v447_v55  ;;  %v448_v59 = vsel %vm445_vm11, %v2527_v52, 0.0 }
 0x1ee   : > { %2420 = vmatprep.subr.msk.bf16.mxu0 %vm3122_vm13, %v2175_v54  ;;  %v2529_v61 = vpack.i.bf16 %v448_v59, %v446_v57 }
 0x1ef   : > { %2540 = vrot.lane.b32.xlu1 %v2539_v58, %s3033_s11  ;;  %2421 = vmatpush3.bf16.msk.msra.mxu0 %vm3122_vm13, %v2175_v54 }
 0x1f0   : > { %2530 = vrot.lane.b32.xlu0 %v2529_v61, %s3033_s11 }
 0x1f3   : > { %2545 = vrot.lane.b32.xlu1 %v2539_v58, %s3035_s13 }
 0x1f4   : > { %2535 = vrot.lane.b32.xlu0 %v2529_v61, %s3035_s13 }
 0x1f7   : > { %488 = vperm.xlu1 %2523, %v434_v62  }
 0x1f8   : > { %483 = vperm.xlu0 %2522, %v433_v63  }
 0x1fb   : > { %498 = vperm.xlu1 %2523, %v436_v0   ;;  %v3002_v0 = vld [vmem:[%s3965_s5] sm:$0xff]  }
 0x1fc   : > { %493 = vperm.xlu0 %2522, %v435_v1   ;;  %2442 = vmatprep.mubr.msk.bf16.mxu1 %vm338_vm4, %v3002_v0  ;;  %v612_v1 = vld [vmem:[%s3966_s6 + $0x8] sm:$0xff] }
 0x261   : > { %v2541_v2 = vpop.permute.xlu1 %2540 }
 0x262   : > { %v2543_v3 = vunpack.i.h.bf16 %v2541_v2  ;;  %v2542_v4 = vunpack.i.l.bf16 %v2541_v2  ;;  %v2531_v5 = vpop.permute.xlu0 %2530  ;;  %v611_v2 = vld [vmem:[%s3966_s6] sm:$0xff] }
 0x263   : > { %v2533_v6 = vunpack.i.h.bf16 %v2531_v5  ;;  %v2532_v7 = vunpack.i.l.bf16 %v2531_v5  ;;  %v630_v5 = vld [vmem:[%s3966_s6 + $0x98] sm:$0xff] }
 0x264   : > { %v463_v8 = vsel %vm317_vm1, %v2542_v4, %v2543_v3  ;;  %v628_v3 = vld [vmem:[%s3966_s6 + $0x88] sm:$0xff]  ;;  %v627_v4 = vld [vmem:[%s3966_s6 + $0x80] sm:$0xff] }
 0x265   : > { %v2546_v9 = vpop.permute.xlu1 %2545  ;;  %v462_v10 = vsel %vm317_vm1, %v2532_v7, %v2533_v6  ;;  %v629_v6 = vld [vmem:[%s3966_s6 + $0x90] sm:$0xff]  ;;  %v614_v7 = vld [vmem:[%s3966_s6 + $0x18] sm:$0xff] }
 0x266   : > { %v2548_v11 = vunpack.i.h.bf16 %v2546_v9  ;;  %v2547_v12 = vunpack.i.l.bf16 %v2546_v9  ;;  %v2536_v13 = vpop.permute.xlu0 %2535  ;;  %v479_v14 = vpack.c.bf16 %v463_v8, %v462_v10  ;;  %v613_v8 = vld [vmem:[%s3966_s6 + $0x10] sm:$0xff]  ;;  %v632_v9 = vld [vmem:[%s3966_s6 + $0xa8] sm:$0xff]  ;;  %v631_v10 = vld [vmem:[%s3966_s6 + $0xa0] sm:$0xff] }
 0x267   : > { %v2538_v15 = vunpack.i.h.bf16 %v2536_v13  ;;  %v2537_v16 = vunpack.i.l.bf16 %v2536_v13  ;;  %v634_v13 = vld [vmem:[%s3966_s6 + $0xb8] sm:$0xff] }
 0x268   : > { %2422 = vmatprep.subr.bf16.mxu0 %v479_v14  ;;  %v475_v17 = vsel %vm324_vm3, %v2547_v12, %v2548_v11  ;;  %v616_v11 = vld [vmem:[%s3966_s6 + $0x28] sm:$0xff]  ;;  %v615_v12 = vld [vmem:[%s3966_s6 + $0x20] sm:$0xff] }
 0x269   : > { %2423 = vmatpush3.bf16.msra.mxu0 %v479_v14  ;;  %v474_v18 = vsel %vm324_vm3, %v2537_v16, %v2538_v15  ;;  %v633_v14 = vld [vmem:[%s3966_s6 + $0xb0] sm:$0xff]  ;;  %v618_v15 = vld [vmem:[%s3966_s6 + $0x38] sm:$0xff] }
 0x26a   : > { %v480_v19 = vpack.c.bf16 %v475_v17, %v474_v18  ;;  %v617_v16 = vld [vmem:[%s3966_s6 + $0x30] sm:$0xff]  ;;  %v636_v17 = vld [vmem:[%s3966_s6 + $0xc8] sm:$0xff]  ;;  %v635_v18 = vld [vmem:[%s3966_s6 + $0xc0] sm:$0xff] }
 0x26c   : > { %2424 = vmatprep.subr.bf16.mxu0 %v480_v19 }
 0x26d   : > { %2425 = vmatpush3.bf16.msra.mxu0 %v480_v19  ;;  %v620_v19 = vld [vmem:[%s3966_s6 + $0x48] sm:$0xff] }
 0x270   : > { %2427 = vmatmul.mubr.msk.bf16.vlgmr.msra.gmra.mrb[4].mxu0 %vm511_vm14, %v3001_v20  ;;  %v619_v20 = vld [vmem:[%s3966_s6 + $0x40] sm:$0xff] }
 0x276   : > { %v489_v22 = vpop.permute.xlu1 %488 }
 0x277   : > { %v484_v21 = vpop.permute.xlu0 %483 }
 0x27a   : > { %v499_v27 = vpop.permute.xlu1 %498 }
 0x27b   : > { %v494_v23 = vpop.permute.xlu0 %493 }
 0x343   : > { %v2428_v24 = vpop.f32.mrb[4].mxu0 }
 0x344   : > { %v561_v25 = vadd.f32 %v2428_v24, %v494_v23  ;;  %v552_v26 = vpop.f32.mrb[5].mxu0  ;;  %v622_v23 = vld [vmem:[%s3966_s6 + $0x58] sm:$0xff]  ;;  %v621_v24 = vld [vmem:[%s3966_s6 + $0x50] sm:$0xff] }
 0x345   : > { %v553_v28 = vadd.f32 %v552_v26, %v484_v21  ;;  %v2429_v29 = vpop.f32.mrb[6].mxu0  ;;  %v638_v21 = vld [vmem:[%s3966_s6 + $0xd8] sm:$0xff]  ;;  %v639_v26 = vld [vmem:[%s3966_s6 + $0xe0] sm:$0xff] }
 0x346   : > { %v573_v30 = vmul.f32 0.2, %v561_v25  ;;  %v564_v31 = vadd.f32 %v2429_v29, %v499_v27  ;;  %v555_v32 = vpop.f32.mrb[7].mxu0  ;;  %vm569_vm15 = vcmp.gt.f32.partialorder %v561_v25, 0.0  ;;  %v624_v27 = vld [vmem:[%s3966_s6 + $0x68] sm:$0xff]  ;;  %v642_v29 = vld [vmem:[%s3966_s6 + $0xf8] sm:$0xff] }
 0x347   : > { %v571_v33 = vmul.f32 0.2, %v553_v28  ;;  %v556_v34 = vadd.f32 %v555_v32, %v489_v22  ;;  %vm567_vm0 = vcmp.gt.f32.partialorder %v553_v28, 0.0  ;;  %v637_v22 = vld [vmem:[%s3966_s6 + $0xd0] sm:$0xff] }
 0x348   : > { %vm570_vm2 = vcmp.gt.f32.partialorder %v564_v31, 0.0  ;;  %v574_v35 = vmul.f32 0.2, %v564_v31  ;;  %v577_v37 = vsel %vm569_vm15, %v561_v25, %v573_v30  ;;  %v640_v25 = vld [vmem:[%s3966_s6 + $0xe8] sm:$0xff]  ;;  %v641_v30 = vld [vmem:[%s3966_s6 + $0xf0] sm:$0xff] }
 0x349   : > { %vm568_vm5 = vcmp.gt.f32.partialorder %v556_v34, 0.0  ;;  %v572_v36 = vmul.f32 0.2, %v556_v34  ;;  %v575_v40 = vsel %vm567_vm0, %v553_v28, %v571_v33  ;;  %v623_v28 = vld [vmem:[%s3966_s6 + $0x60] sm:$0xff]  ;;  %v625_v32 = vld [vmem:[%s3966_s6 + $0x70] sm:$0xff] }
 0x34a   : > { %v578_v38 = vsel %vm570_vm2, %v564_v31, %v574_v35  ;;  %v626_v31 = vld [vmem:[%s3966_s6 + $0x78] sm:$0xff] }
 0x34b   : > { %v2554_v39 = vpack.i.bf16 %v578_v38, %v577_v37  ;;  %v576_v41 = vsel %vm568_vm5, %v556_v34, %v572_v36 }
 0x34c   : > { %v2549_v42 = vpack.i.bf16 %v576_v41, %v575_v40 }
 0x34d   : > { %2555 = vrot.lane.b32.xlu1 %v2554_v39, %s3041_s23 }
 0x34e   : > { %2550 = vrot.lane.b32.xlu0 %v2549_v42, %s3041_s23 }
 0x3bf   : > { %v2556_v43 = vpop.permute.xlu1 %2555 }
 0x3c0   : > { %v2551_v44 = vpop.permute.xlu0 %2550  ;;  %v2558_v45 = vunpack.i.h.bf16 %v2556_v43  ;;  %v2557_v46 = vunpack.i.l.bf16 %v2556_v43 }
 0x3c1   : > { %v2553_v47 = vunpack.i.h.bf16 %v2551_v44  ;;  %v2552_v48 = vunpack.i.l.bf16 %v2551_v44 }
 0x3c2   : > { %v2203_v57 = vpack.c.bf16 %v2558_v45, %v2557_v46  ;;  %v662_v58 = vsel %vm445_vm11, 0.0, %v2558_v45  ;;  %v666_v59 = vsel %vm445_vm11, %v2558_v45, 0.0  ;;  %v661_v60 = vsel %vm445_vm11, 0.0, %v2557_v46 }
 0x3c3   : > { %v2198_v49 = vpack.c.bf16 %v2553_v47, %v2552_v48  ;;  %v660_v50 = vsel %vm445_vm11, 0.0, %v2553_v47  ;;  %v664_v51 = vsel %vm445_vm11, %v2553_v47, 0.0  ;;  %v659_v52 = vsel %vm445_vm11, 0.0, %v2552_v48 }
 0x3c4   : > { %v2569_v54 = vpack.i.bf16 %v664_v51, %v660_v50  ;;  %v663_v55 = vsel %vm445_vm11, %v2552_v48, 0.0  ;;  %v665_v61 = vsel %vm445_vm11, %v2557_v46, 0.0  ;;  %v2574_v62 = vpack.i.bf16 %v666_v59, %v662_v58 }
 0x3c5   : > { %2430 = vmatprep.subr.msk.bf16.mxu1 %vm3122_vm13, %v2198_v49  ;;  %v2559_v56 = vpack.i.bf16 %v663_v55, %v659_v52  ;;  %v2564_v63 = vpack.i.bf16 %v665_v61, %v661_v60 }
 0x3c6   : > { %2570 = vrot.lane.b32.xlu1 %v2569_v54, %s3033_s11  ;;  %2431 = vmatpush3.bf16.msk.msra.mxu1 %vm3122_vm13, %v2198_v49 }
 0x3c7   : > { %2560 = vrot.lane.b32.xlu0 %v2559_v56, %s3033_s11  ;;  %2432 = vmatprep.subr.msk.bf16.mxu1 %vm3122_vm13, %v2203_v57 }
 0x3ca   : > { %2575 = vrot.lane.b32.xlu1 %v2574_v62, %s3033_s11  ;;  %2433 = vmatpush3.bf16.msk.msra.mxu1 %vm3122_vm13, %v2203_v57 }
 0x3cb   : > { %2565 = vrot.lane.b32.xlu0 %v2564_v63, %s3033_s11 }
 0x3ce   : > { %2590 = vrot.lane.b32.xlu1 %v2569_v54, %s3035_s13 }
 0x3cf   : > { %2580 = vrot.lane.b32.xlu0 %v2559_v56, %s3035_s13 }
 0x3d2   : > { %2595 = vrot.lane.b32.xlu1 %v2574_v62, %s3035_s13 }
 0x3d3   : > { %2585 = vrot.lane.b32.xlu0 %v2564_v63, %s3035_s13 }
 0x3d6   : > { %736 = vperm.xlu1 %2523, %v612_v1  }
 0x3d7   : > { %731 = vperm.xlu0 %2522, %v611_v2  }
 0x3da   : > { %816 = vperm.xlu1 %2523, %v628_v3  }
 0x3db   : > { %811 = vperm.xlu0 %2522, %v627_v4  }
 0x3de   : > { %826 = vperm.xlu1 %2523, %v630_v5  }
 0x3df   : > { %821 = vperm.xlu0 %2522, %v629_v6   ;;  %v3003_v6 = vld [vmem:[%s3965_s5 + $0x8] sm:$0xff]  }
 0x3e2   : > { %746 = vperm.xlu1 %2523, %v614_v7   ;;  %v3004_v7 = vld [vmem:[%s3965_s5 + $0x10] sm:$0xff]  }
 0x3e3   : > { %741 = vperm.xlu0 %2522, %v613_v8   ;;  %v3005_v8 = vld [vmem:[%s3965_s5 + $0x18] sm:$0xff]  }
 0x3e6   : > { %836 = vperm.xlu1 %2523, %v632_v9   ;;  %v3006_v9 = vld [vmem:[%s3965_s5 + $0x20] sm:$0xff]  }
 0x3e7   : > { %831 = vperm.xlu0 %2522, %v631_v10   ;;  %v3007_v10 = vld [vmem:[%s3965_s5 + $0x28] sm:$0xff]  }
 0x3ea   : > { %756 = vperm.xlu1 %2523, %v616_v11   ;;  %v3008_v11 = vld [vmem:[%s3965_s5 + $0x30] sm:$0xff]  }
 0x3eb   : > { %751 = vperm.xlu0 %2522, %v615_v12   ;;  %v3009_v12 = vld [vmem:[%s3965_s5 + $0x38] sm:$0xff]  }
 0x3ee   : > { %846 = vperm.xlu1 %2523, %v634_v13   ;;  %v3010_v13 = vld [vmem:[%s3965_s5 + $0x40] sm:$0xff]  }
 0x3ef   : > { %841 = vperm.xlu0 %2522, %v633_v14   ;;  %v3011_v14 = vld [vmem:[%s3965_s5 + $0x48] sm:$0xff]  }
 0x3f2   : > { %766 = vperm.xlu1 %2523, %v618_v15   ;;  %v3012_v15 = vld [vmem:[%s3965_s5 + $0x50] sm:$0xff]  }
 0x3f3   : > { %761 = vperm.xlu0 %2522, %v617_v16   ;;  %v3013_v16 = vld [vmem:[%s3965_s5 + $0x58] sm:$0xff]  }
 0x3f6   : > { %856 = vperm.xlu1 %2523, %v636_v17   ;;  %v3014_v17 = vld [vmem:[%s3965_s5 + $0x60] sm:$0xff]  }
 0x3f7   : > { %851 = vperm.xlu0 %2522, %v635_v18   ;;  %v3015_v18 = vld [vmem:[%s3965_s5 + $0x68] sm:$0xff]  }
 0x3fa   : > { %776 = vperm.xlu1 %2523, %v620_v19   ;;  %v3016_v19 = vld [vmem:[%s3965_s5 + $0x70] sm:$0xff]  }
 0x3fb   : > { %771 = vperm.xlu0 %2522, %v619_v20   ;;  %v3017_v20 = vld [vmem:[%s3965_s5 + $0x78] sm:$0xff]  }
 0x3fe   : > { %866 = vperm.xlu1 %2523, %v638_v21  }
 0x3ff   : > { %861 = vperm.xlu0 %2522, %v637_v22  }
 0x402   : > { %786 = vperm.xlu1 %2523, %v622_v23  }
 0x403   : > { %781 = vperm.xlu0 %2522, %v621_v24  }
 0x406   : > { %876 = vperm.xlu1 %2523, %v640_v25  }
 0x407   : > { %871 = vperm.xlu0 %2522, %v639_v26  }
 0x40a   : > { %796 = vperm.xlu1 %2523, %v624_v27  }
 0x40b   : > { %791 = vperm.xlu0 %2522, %v623_v28  }
 0x40e   : > { %886 = vperm.xlu1 %2523, %v642_v29  }
 0x40f   : > { %881 = vperm.xlu0 %2522, %v641_v30  }
 0x412   : > { %806 = vperm.xlu1 %2523, %v626_v31  }
 0x413   : > { %801 = vperm.xlu0 %2522, %v625_v32  }
 0x438   : > { %v2571_v33 = vpop.permute.xlu1 %2570 }
 0x439   : > { %v2573_v34 = vunpack.i.h.bf16 %v2571_v33  ;;  %v2572_v35 = vunpack.i.l.bf16 %v2571_v33  ;;  %v2561_v36 = vpop.permute.xlu0 %2560 }
 0x43a   : > { %v2563_v37 = vunpack.i.h.bf16 %v2561_v36  ;;  %v2562_v38 = vunpack.i.l.bf16 %v2561_v36 }
 0x43b   : > { %v692_v39 = vsel %vm317_vm1, %v2572_v35, %v2573_v34 }
 0x43c   : > { %v2576_v40 = vpop.permute.xlu1 %2575  ;;  %v691_v41 = vsel %vm317_vm1, %v2562_v38, %v2563_v37 }
 0x43d   : > { %v2578_v42 = vunpack.i.h.bf16 %v2576_v40  ;;  %v2577_v43 = vunpack.i.l.bf16 %v2576_v40  ;;  %v2566_v44 = vpop.permute.xlu0 %2565  ;;  %v725_v45 = vpack.c.bf16 %v692_v39, %v691_v41 }
 0x43e   : > { %v2568_v46 = vunpack.i.h.bf16 %v2566_v44  ;;  %v2567_v47 = vunpack.i.l.bf16 %v2566_v44 }
 0x43f   : > { %2434 = vmatprep.subr.bf16.mxu1 %v725_v45  ;;  %v694_v48 = vsel %vm317_vm1, %v2577_v43, %v2578_v42 }
 0x440   : > { %2435 = vmatpush3.bf16.msra.mxu1 %v725_v45  ;;  %v2591_v49 = vpop.permute.xlu1 %2590  ;;  %v693_v50 = vsel %vm317_vm1, %v2567_v47, %v2568_v46 }
 0x441   : > { %v2593_v51 = vunpack.i.h.bf16 %v2591_v49  ;;  %v2592_v52 = vunpack.i.l.bf16 %v2591_v49  ;;  %v2581_v54 = vpop.permute.xlu0 %2580  ;;  %v726_v55 = vpack.c.bf16 %v694_v48, %v693_v50 }
 0x442   : > { %v2583_v56 = vunpack.i.h.bf16 %v2581_v54  ;;  %v2582_v57 = vunpack.i.l.bf16 %v2581_v54 }
 0x443   : > { %2436 = vmatprep.subr.bf16.mxu1 %v726_v55  ;;  %v716_v58 = vsel %vm324_vm3, %v2592_v52, %v2593_v51 }
 0x444   : > { %2437 = vmatpush3.bf16.msra.mxu1 %v726_v55  ;;  %v2596_v59 = vpop.permute.xlu1 %2595  ;;  %v715_v60 = vsel %vm324_vm3, %v2582_v57, %v2583_v56 }
 0x445   : > { %v2598_v61 = vunpack.i.h.bf16 %v2596_v59  ;;  %v2597_v62 = vunpack.i.l.bf16 %v2596_v59  ;;  %v2586_v63 = vpop.permute.xlu0 %2585  ;;  %v727_v0 = vpack.c.bf16 %v716_v58, %v715_v60 }
 0x446   : > { %v2588_v1 = vunpack.i.h.bf16 %v2586_v63  ;;  %v2587_v2 = vunpack.i.l.bf16 %v2586_v63 }
 0x447   : > { %2438 = vmatprep.subr.bf16.mxu1 %v727_v0  ;;  %v718_v3 = vsel %vm324_vm3, %v2597_v62, %v2598_v61 }
 0x448   : > { %2439 = vmatpush3.bf16.msra.mxu1 %v727_v0  ;;  %v717_v4 = vsel %vm324_vm3, %v2587_v2, %v2588_v1 }
 0x449   : > { %v728_v5 = vpack.c.bf16 %v718_v3, %v717_v4 }
 0x44b   : > { %2440 = vmatprep.subr.bf16.mxu1 %v728_v5 }
 0x44c   : > { %2441 = vmatpush3.bf16.msra.mxu1 %v728_v5 }
 0x44f   : > { %2443 = vmatmul.mubr.msk.bf16.vlgmr.msra.gmra.mrb[0].mxu1 %vm338_vm4, %v3003_v6 }
 0x450   : > { %2446 = vmatprep.mubr.msk.bf16.mxu1 %vm338_vm4, %v3004_v7 }
 0x455   : > { %v737_v22 = vpop.permute.xlu1 %736 }
 0x456   : > { %v732_v21 = vpop.permute.xlu0 %731 }
 0x457   : > { %2447 = vmatmul.mubr.msk.bf16.gmra.mrb[4].mxu1 %vm338_vm4, %v3005_v8 }
 0x458   : > { %2450 = vmatprep.mubr.msk.bf16.mxu1 %vm338_vm4, %v3006_v9 }
 0x459   : > { %v3358_v24 = vpop.permute.xlu1 %816 }
 0x45a   : > { %v3356_v23 = vpop.permute.xlu0 %811 }
 0x45d   : > { %v3362_v26 = vpop.permute.xlu1 %826 }
 0x45e   : > { %v3360_v25 = vpop.permute.xlu0 %821 }
 0x45f   : > { %2451 = vmatmul.mubr.msk.bf16.gmra.mrb[8].mxu1 %vm338_vm4, %v3007_v10 }
 0x460   : > { %2454 = vmatprep.mubr.msk.bf16.mxu1 %vm338_vm4, %v3008_v11 }
 0x461   : > { %v747_v28 = vpop.permute.xlu1 %746 }
 0x462   : > { %v742_v27 = vpop.permute.xlu0 %741 }
 0x465   : > { %v3366_v30 = vpop.permute.xlu1 %836 }
 0x466   : > { %v3364_v29 = vpop.permute.xlu0 %831 }
 0x467   : > { %2455 = vmatmul.mubr.msk.bf16.gmra.mrb[12].mxu1 %vm338_vm4, %v3009_v12 }
 0x468   : > { %2458 = vmatprep.mubr.msk.bf16.mxu1 %vm338_vm4, %v3010_v13 }
 0x469   : > { %v757_v32 = vpop.permute.xlu1 %756 }
 0x46a   : > { %v752_v31 = vpop.permute.xlu0 %751 }
 0x46d   : > { %v3370_v34 = vpop.permute.xlu1 %846 }
 0x46e   : > { %v3368_v33 = vpop.permute.xlu0 %841 }
 0x46f   : > { %2459 = vmatmul.mubr.msk.bf16.gmra.mrb[16].mxu1 %vm338_vm4, %v3011_v14 }
 0x470   : > { %2462 = vmatprep.mubr.msk.bf16.mxu1 %vm338_vm4, %v3012_v15 }
 0x471   : > { %v767_v36 = vpop.permute.xlu1 %766 }
 0x472   : > { %v762_v35 = vpop.permute.xlu0 %761 }
 0x475   : > { %v3374_v38 = vpop.permute.xlu1 %856 }
 0x476   : > { %v3372_v37 = vpop.permute.xlu0 %851 }
 0x477   : > { %2463 = vmatmul.mubr.msk.bf16.gmra.mrb[20].mxu1 %vm338_vm4, %v3013_v16 }
 0x478   : > { %2466 = vmatprep.mubr.msk.bf16.mxu1 %vm338_vm4, %v3014_v17 }
 0x479   : > { %v3376_v40 = vpop.permute.xlu1 %776 }
 0x47a   : > { %v772_v39 = vpop.permute.xlu0 %771 }
 0x47d   : > { %v3380_v42 = vpop.permute.xlu1 %866 }
 0x47e   : > { %v3378_v41 = vpop.permute.xlu0 %861 }
 0x47f   : > { %2467 = vmatmul.mubr.msk.bf16.gmra.mrb[24].mxu1 %vm338_vm4, %v3015_v18 }
 0x480   : > { %2470 = vmatprep.mubr.msk.bf16.mxu1 %vm338_vm4, %v3016_v19 }
 0x481   : > { %v787_v47 = vpop.permute.xlu1 %786 }
 0x482   : > { %v782_v43 = vpop.permute.xlu0 %781 }
 0x485   : > { %v3384_v61 = vpop.permute.xlu1 %876 }
 0x486   : > { %v3382_v57 = vpop.permute.xlu0 %871 }
 0x487   : > { %2471 = vmatmul.mubr.msk.bf16.gmra.mrb[28].mxu1 %vm338_vm4, %v3017_v20 }
 0x489   : > { %v797_v14 = vpop.permute.xlu1 %796 }
 0x48a   : > { %v792_v10 = vpop.permute.xlu0 %791 }
 0x522   : > { %v2444_v44 = vpop.f32.mrb[0].mxu1 }
 0x523   : > { %v1060_v45 = vadd.f32 %v2444_v44, %v742_v27  ;;  %v1051_v46 = vpop.f32.mrb[1].mxu1 }
 0x524   : > { %v1052_v48 = vadd.f32 %v1051_v46, %v732_v21  ;;  %v2445_v49 = vpop.f32.mrb[2].mxu1  ;;  %v3391_v46 = vpop.permute.xlu1 %886 }
 0x525   : > { %v1212_v50 = vmul.f32 0.2, %v1060_v45  ;;  %v1063_v51 = vadd.f32 %v2445_v49, %v747_v28  ;;  %v1054_v52 = vpop.f32.mrb[3].mxu1  ;;  %vm1180_vm4 = vcmp.gt.f32.partialorder %v1060_v45, 0.0 }
 0x526   : > { %v1210_v54 = vmul.f32 0.2, %v1052_v48  ;;  %v1055_v55 = vadd.f32 %v1054_v52, %v737_v22  ;;  %vm1178_vm6 = vcmp.gt.f32.partialorder %v1052_v48, 0.0 }
 0x527   : > { %vm1181_vm7 = vcmp.gt.f32.partialorder %v1063_v51, 0.0  ;;  %v1213_v56 = vmul.f32 0.2, %v1063_v51  ;;  %v1244_v59 = vsel %vm1180_vm4, %v1060_v45, %v1212_v50 }
 0x528   : > { %vm1179_vm8 = vcmp.gt.f32.partialorder %v1055_v55, 0.0  ;;  %v1211_v58 = vmul.f32 0.2, %v1055_v55  ;;  %v1242_v0 = vsel %vm1178_vm6, %v1052_v48, %v1210_v54 }
 0x529   : > { %v1245_v60 = vsel %vm1181_vm7, %v1063_v51, %v1213_v56 }
 0x52a   : > { %v2448_v62 = vpop.f32.mrb[4].mxu1  ;;  %v2599_v63 = vpack.i.bf16 %v1245_v60, %v1244_v59  ;;  %v1243_v1 = vsel %vm1179_vm8, %v1055_v55, %v1211_v58 }
 0x52b   : > { %v1076_v2 = vadd.f32 %v2448_v62, %v762_v35  ;;  %v1067_v3 = vpop.f32.mrb[5].mxu1  ;;  %v2604_v4 = vpack.i.bf16 %v1243_v1, %v1242_v0  ;;  %v807_v62 = vpop.permute.xlu1 %806 }
 0x52c   : > { %v1068_v5 = vadd.f32 %v1067_v3, %v752_v31  ;;  %2600 = vrot.lane.b32.xlu1 %v2599_v63, %s3041_s23  ;;  %v2449_v6 = vpop.f32.mrb[6].mxu1  ;;  %v3388_v31 = vpop.permute.xlu0 %881 }
 0x52d   : > { %v1216_v7 = vmul.f32 0.2, %v1076_v2  ;;  %v1079_v8 = vadd.f32 %v2449_v6, %v767_v36  ;;  %v1070_v9 = vpop.f32.mrb[7].mxu1  ;;  %vm1184_vm9 = vcmp.gt.f32.partialorder %v1076_v2, 0.0 }
 0x52e   : > { %v1214_v11 = vmul.f32 0.2, %v1068_v5  ;;  %v1071_v12 = vadd.f32 %v1070_v9, %v757_v32  ;;  %vm1182_vm10 = vcmp.gt.f32.partialorder %v1068_v5, 0.0 }
 0x52f   : > { %vm1185_vm12 = vcmp.gt.f32.partialorder %v1079_v8, 0.0  ;;  %v1217_v13 = vmul.f32 0.2, %v1079_v8  ;;  %v1248_v16 = vsel %vm1184_vm9, %v1076_v2, %v1216_v7 }
 0x530   : > { %vm1183_vm14 = vcmp.gt.f32.partialorder %v1071_v12, 0.0  ;;  %v1215_v15 = vmul.f32 0.2, %v1071_v12  ;;  %2605 = vrot.lane.b32.xlu1 %v2604_v4, %s3041_s23  ;;  %v1246_v20 = vsel %vm1182_vm10, %v1068_v5, %v1214_v11  ;;  %v802_v52 = vpop.permute.xlu0 %801 }
 0x531   : > { %v1249_v17 = vsel %vm1185_vm12, %v1079_v8, %v1217_v13 }
 0x532   : > { %v2452_v18 = vpop.f32.mrb[8].mxu1  ;;  %v2609_v19 = vpack.i.bf16 %v1249_v17, %v1248_v16  ;;  %v1247_v21 = vsel %vm1183_vm14, %v1071_v12, %v1215_v15 }
 0x533   : > { %v1092_v22 = vadd.f32 %v2452_v18, %v782_v43  ;;  %v1083_v27 = vpop.f32.mrb[9].mxu1  ;;  %v2614_v28 = vpack.i.bf16 %v1247_v21, %v1246_v20 }
 0x534   : > { %v1084_v32 = vadd.f32 %v1083_v27, %v772_v39  ;;  %v2453_v35 = vpop.f32.mrb[10].mxu1  ;;  %2610 = vrot.lane.b32.xlu1 %v2609_v19, %s3041_s23 }
 0x535   : > { %v1220_v36 = vmul.f32 0.2, %v1092_v22  ;;  %v1095_v44 = vadd.f32 %v2453_v35, %v787_v47  ;;  %v1086_v45 = vpop.f32.mrb[11].mxu1  ;;  %vm1188_vm15 = vcmp.gt.f32.partialorder %v1092_v22, 0.0 }
 0x536   : > { %v1218_v48 = vmul.f32 0.2, %v1084_v32  ;;  %v1087_v49 = vadd.f32 %v1086_v45, %v3376_v40  ;;  %vm1186_vm0 = vcmp.gt.f32.partialorder %v1084_v32, 0.0 }
 0x537   : > { %vm1189_vm2 = vcmp.gt.f32.partialorder %v1095_v44, 0.0  ;;  %v1221_v43 = vmul.f32 0.2, %v1095_v44  ;;  %v1252_v39 = vsel %vm1188_vm15, %v1092_v22, %v1220_v36 }
 0x538   : > { %vm1187_vm5 = vcmp.gt.f32.partialorder %v1087_v49, 0.0  ;;  %v1219_v50 = vmul.f32 0.2, %v1087_v49  ;;  %2615 = vrot.lane.b32.xlu1 %v2614_v28, %s3041_s23  ;;  %v1250_v47 = vsel %vm1186_vm0, %v1084_v32, %v1218_v48 }
 0x539   : > { %v1253_v51 = vsel %vm1189_vm2, %v1095_v44, %v1221_v43 }
 0x53a   : > { %v2456_v54 = vpop.f32.mrb[12].mxu1  ;;  %v2619_v55 = vpack.i.bf16 %v1253_v51, %v1252_v39  ;;  %v1251_v56 = vsel %vm1187_vm5, %v1087_v49, %v1219_v50 }
 0x53b   : > { %v1108_v58 = vadd.f32 %v2456_v54, %v802_v52  ;;  %v1099_v59 = vpop.f32.mrb[13].mxu1  ;;  %v2624_v60 = vpack.i.bf16 %v1251_v56, %v1250_v47 }
 0x53c   : > { %v1100_v63 = vadd.f32 %v1099_v59, %v792_v10  ;;  %v2457_v40 = vpop.f32.mrb[14].mxu1  ;;  %2620 = vrot.lane.b32.xlu1 %v2619_v55, %s3041_s23 }
 0x53d   : > { %v1224_v0 = vmul.f32 0.2, %v1108_v58  ;;  %v1111_v1 = vadd.f32 %v2457_v40, %v807_v62  ;;  %v1102_v2 = vpop.f32.mrb[15].mxu1  ;;  %vm1192_vm4 = vcmp.gt.f32.partialorder %v1108_v58, 0.0 }
 0x53e   : > { %v1222_v3 = vmul.f32 0.2, %v1100_v63  ;;  %v1103_v4 = vadd.f32 %v1102_v2, %v797_v14  ;;  %vm1190_vm6 = vcmp.gt.f32.partialorder %v1100_v63, 0.0 }
 0x53f   : > { %vm1193_vm7 = vcmp.gt.f32.partialorder %v1111_v1, 0.0  ;;  %v1225_v5 = vmul.f32 0.2, %v1111_v1  ;;  %v1256_v7 = vsel %vm1192_vm4, %v1108_v58, %v1224_v0 }
 0x540   : > { %vm1191_vm8 = vcmp.gt.f32.partialorder %v1103_v4, 0.0  ;;  %v1223_v6 = vmul.f32 0.2, %v1103_v4  ;;  %2625 = vrot.lane.b32.xlu1 %v2624_v60, %s3041_s23  ;;  %v1254_v11 = vsel %vm1190_vm6, %v1100_v63, %v1222_v3 }
 0x541   : > { %v1257_v8 = vsel %vm1193_vm7, %v1111_v1, %v1225_v5 }
 0x542   : > { %v2460_v9 = vpop.f32.mrb[16].mxu1  ;;  %v2629_v10 = vpack.i.bf16 %v1257_v8, %v1256_v7  ;;  %v1255_v12 = vsel %vm1191_vm8, %v1103_v4, %v1223_v6 }
 0x543   : > { %v1124_v13 = vadd.f32 %v2460_v9, %v3360_v25  ;;  %v1115_v15 = vpop.f32.mrb[17].mxu1  ;;  %v2634_v16 = vpack.i.bf16 %v1255_v12, %v1254_v11 }
 0x544   : > { %v1116_v17 = vadd.f32 %v1115_v15, %v3356_v23  ;;  %v2461_v14 = vpop.f32.mrb[18].mxu1  ;;  %2630 = vrot.lane.b32.xlu1 %v2629_v10, %s3041_s23 }
 0x545   : > { %v1228_v18 = vmul.f32 0.2, %v1124_v13  ;;  %v1127_v19 = vadd.f32 %v2461_v14, %v3362_v26  ;;  %v1118_v20 = vpop.f32.mrb[19].mxu1  ;;  %vm1196_vm9 = vcmp.gt.f32.partialorder %v1124_v13, 0.0 }
 0x546   : > { %v1226_v21 = vmul.f32 0.2, %v1116_v17  ;;  %v1119_v22 = vadd.f32 %v1118_v20, %v3358_v24  ;;  %vm1194_vm10 = vcmp.gt.f32.partialorder %v1116_v17, 0.0 }
 0x547   : > { %vm1197_vm12 = vcmp.gt.f32.partialorder %v1127_v19, 0.0  ;;  %v1229_v27 = vmul.f32 0.2, %v1127_v19  ;;  %v1260_v28 = vsel %vm1196_vm9, %v1124_v13, %v1228_v18 }
 0x548   : > { %vm1195_vm14 = vcmp.gt.f32.partialorder %v1119_v22, 0.0  ;;  %v1227_v25 = vmul.f32 0.2, %v1119_v22  ;;  %2635 = vrot.lane.b32.xlu1 %v2634_v16, %s3041_s23  ;;  %v1258_v36 = vsel %vm1194_vm10, %v1116_v17, %v1226_v21 }
 0x549   : > { %v1261_v23 = vsel %vm1197_vm12, %v1127_v19, %v1229_v27 }
 0x54a   : > { %v2464_v32 = vpop.f32.mrb[20].mxu1  ;;  %v2639_v35 = vpack.i.bf16 %v1261_v23, %v1260_v28  ;;  %v1259_v44 = vsel %vm1195_vm14, %v1119_v22, %v1227_v25 }
 0x54b   : > { %v1140_v26 = vadd.f32 %v2464_v32, %v3368_v33  ;;  %v1131_v45 = vpop.f32.mrb[21].mxu1  ;;  %v2644_v48 = vpack.i.bf16 %v1259_v44, %v1258_v36 }
 0x54c   : > { %v1132_v49 = vadd.f32 %v1131_v45, %v3364_v29  ;;  %2640 = vrot.lane.b32.xlu0 %v2639_v35, %s3041_s23  ;;  %v2465_v24 = vpop.f32.mrb[22].mxu1 }
 0x54d   : > { %v1232_v43 = vmul.f32 0.2, %v1140_v26  ;;  %v1143_v50 = vadd.f32 %v2465_v24, %v3370_v34  ;;  %v1134_v39 = vpop.f32.mrb[23].mxu1  ;;  %vm1200_vm15 = vcmp.gt.f32.partialorder %v1140_v26, 0.0 }
 0x54e   : > { %v1230_v51 = vmul.f32 0.2, %v1132_v49  ;;  %v1135_v52 = vadd.f32 %v1134_v39, %v3366_v30  ;;  %vm1198_vm0 = vcmp.gt.f32.partialorder %v1132_v49, 0.0 }
 0x54f   : > { %vm1201_vm2 = vcmp.gt.f32.partialorder %v1143_v50, 0.0  ;;  %v1233_v54 = vmul.f32 0.2, %v1143_v50  ;;  %v1264_v55 = vsel %vm1200_vm15, %v1140_v26, %v1232_v43 }
 0x550   : > { %vm1199_vm5 = vcmp.gt.f32.partialorder %v1135_v52, 0.0  ;;  %v1231_v33 = vmul.f32 0.2, %v1135_v52  ;;  %2645 = vrot.lane.b32.xlu0 %v2644_v48, %s3041_s23  ;;  %v1262_v58 = vsel %vm1198_vm0, %v1132_v49, %v1230_v51 }
 0x551   : > { %v1265_v29 = vsel %vm1201_vm2, %v1143_v50, %v1233_v54 }
 0x552   : > { %v2468_v47 = vpop.f32.mrb[24].mxu1  ;;  %v2649_v56 = vpack.i.bf16 %v1265_v29, %v1264_v55  ;;  %v1263_v59 = vsel %vm1199_vm5, %v1135_v52, %v1231_v33 }
 0x553   : > { %v1156_v34 = vadd.f32 %v2468_v47, %v3378_v41  ;;  %v1147_v60 = vpop.f32.mrb[25].mxu1  ;;  %v2654_v62 = vpack.i.bf16 %v1263_v59, %v1262_v58 }
 0x554   : > { %v1148_v63 = vadd.f32 %v1147_v60, %v3372_v37  ;;  %v2469_v30 = vpop.f32.mrb[26].mxu1  ;;  %2650 = vrot.lane.b32.xlu0 %v2649_v56, %s3041_s23 }
 0x555   : > { %v1236_v40 = vmul.f32 0.2, %v1156_v34  ;;  %v1159_v0 = vadd.f32 %v2469_v30, %v3380_v42  ;;  %v1150_v1 = vpop.f32.mrb[27].mxu1  ;;  %vm1204_vm4 = vcmp.gt.f32.partialorder %v1156_v34, 0.0 }
 0x556   : > { %v1234_v2 = vmul.f32 0.2, %v1148_v63  ;;  %v1151_v3 = vadd.f32 %v1150_v1, %v3374_v38  ;;  %vm1202_vm6 = vcmp.gt.f32.partialorder %v1148_v63, 0.0 }
 0x557   : > { %vm1205_vm7 = vcmp.gt.f32.partialorder %v1159_v0, 0.0  ;;  %v1237_v4 = vmul.f32 0.2, %v1159_v0  ;;  %v1268_v5 = vsel %vm1204_vm4, %v1156_v34, %v1236_v40 }
 0x558   : > { %vm1203_vm8 = vcmp.gt.f32.partialorder %v1151_v3, 0.0  ;;  %v1235_v41 = vmul.f32 0.2, %v1151_v3  ;;  %2655 = vrot.lane.b32.xlu0 %v2654_v62, %s3041_s23  ;;  %v1266_v8 = vsel %vm1202_vm6, %v1148_v63, %v1234_v2 }
 0x559   : > { %v1269_v37 = vsel %vm1205_vm7, %v1159_v0, %v1237_v4 }
 0x55a   : > { %v2472_v6 = vpop.f32.mrb[28].mxu1  ;;  %v2659_v7 = vpack.i.bf16 %v1269_v37, %v1268_v5  ;;  %v1267_v9 = vsel %vm1203_vm8, %v1151_v3, %v1235_v41 }
 0x55b   : > { %v1172_v42 = vadd.f32 %v2472_v6, %v3388_v31  ;;  %v1163_v10 = vpop.f32.mrb[29].mxu1  ;;  %v2664_v11 = vpack.i.bf16 %v1267_v9, %v1266_v8 }
 0x55c   : > { %v1164_v12 = vadd.f32 %v1163_v10, %v3382_v57  ;;  %v2473_v38 = vpop.f32.mrb[30].mxu1  ;;  %2660 = vrot.lane.b32.xlu0 %v2659_v7, %s3041_s23 }
 0x55d   : > { %v1240_v13 = vmul.f32 0.2, %v1172_v42  ;;  %v1175_v15 = vadd.f32 %v2473_v38, %v3391_v46  ;;  %v1166_v16 = vpop.f32.mrb[31].mxu1  ;;  %vm1208_vm9 = vcmp.gt.f32.partialorder %v1172_v42, 0.0 }
 0x55e   : > { %v1238_v17 = vmul.f32 0.2, %v1164_v12  ;;  %v1167_v14 = vadd.f32 %v1166_v16, %v3384_v61  ;;  %vm1206_vm10 = vcmp.gt.f32.partialorder %v1164_v12, 0.0 }
 0x55f   : > { %vm1209_vm12 = vcmp.gt.f32.partialorder %v1175_v15, 0.0  ;;  %v1241_v18 = vmul.f32 0.2, %v1175_v15  ;;  %v1272_v19 = vsel %vm1208_vm9, %v1172_v42, %v1240_v13 }
 0x560   : > { %vm1207_vm14 = vcmp.gt.f32.partialorder %v1167_v14, 0.0  ;;  %v1239_v31 = vmul.f32 0.2, %v1167_v14  ;;  %2665 = vrot.lane.b32.xlu0 %v2664_v11, %s3041_s23  ;;  %v1270_v21 = vsel %vm1206_vm10, %v1164_v12, %v1238_v17 }
 0x561   : > { %v1273_v57 = vsel %vm1209_vm12, %v1175_v15, %v1241_v18 }
 0x562   : > { %v2669_v20 = vpack.i.bf16 %v1273_v57, %v1272_v19  ;;  %v1271_v22 = vsel %vm1207_vm14, %v1167_v14, %v1239_v31 }
 0x563   : > { %v2674_v27 = vpack.i.bf16 %v1271_v22, %v1270_v21 }
 0x564   : > { %2670 = vrot.lane.b32.xlu0 %v2669_v20, %s3041_s23 }
 0x568   : > { %2675 = vrot.lane.b32.xlu0 %v2674_v27, %s3041_s23 }
 0x59e   : > { %v2601_v46 = vpop.permute.xlu1 %2600 }
 0x59f   : > { %v3423_v25 = vunpack.i.h.bf16 %v2601_v46  ;;  %v3425_v61 = vunpack.i.l.bf16 %v2601_v46 }
 0x5a1   : > { %v1407_v28 = vsel %vm445_vm11, 0.0, %v3425_v61  ;;  %v1439_v23 = vsel %vm445_vm11, %v3425_v61, 0.0  ;;  %v1408_v32 = vsel %vm445_vm11, 0.0, %v3423_v25  ;;  %v1440_v44 = vsel %vm445_vm11, %v3423_v25, 0.0 }
 0x5a2   : > { %v2606_v35 = vpop.permute.xlu1 %2605  ;;  %v2679_v36 = vpack.i.bf16 %v1439_v23, %v1407_v28  ;;  %v2699_v45 = vpack.i.bf16 %v1440_v44, %v1408_v32 }
 0x5a3   : > { %v3435_v26 = vunpack.i.l.bf16 %v2606_v35  ;;  %v3437_v48 = vunpack.i.h.bf16 %v2606_v35 }
 0x5a4   : > { %2680 = vrot.lane.b32.xlu0 %v2679_v36, %s3033_s11  ;;  %2700 = vrot.lane.b32.xlu1 %v2699_v45, %s3033_s11 }
 0x5a5   : > { %v1405_v24 = vsel %vm445_vm11, 0.0, %v3435_v26  ;;  %v1437_v43 = vsel %vm445_vm11, %v3435_v26, 0.0  ;;  %v1406_v50 = vsel %vm445_vm11, 0.0, %v3437_v48  ;;  %v1438_v39 = vsel %vm445_vm11, %v3437_v48, 0.0 }
 0x5a6   : > { %v2611_v49 = vpop.permute.xlu1 %2610  ;;  %v2689_v52 = vpack.i.bf16 %v1437_v43, %v1405_v24  ;;  %v2709_v33 = vpack.i.bf16 %v1438_v39, %v1406_v50  ;;  %v2230_v23 = vpack.c.bf16 %v3437_v48, %v3435_v26 }
 0x5a7   : > { %v3451_v54 = vunpack.i.l.bf16 %v2611_v49  ;;  %v3453_v55 = vunpack.i.h.bf16 %v2611_v49  ;;  %v2235_v49 = vpack.c.bf16 %v3423_v25, %v3425_v61 }
 0x5a8   : > { %2685 = vrot.lane.b32.xlu0 %v2679_v36, %s3035_s13  ;;  %2705 = vrot.lane.b32.xlu1 %v2699_v45, %s3035_s13 }
 0x5a9   : > { %v1411_v47 = vsel %vm445_vm11, 0.0, %v3451_v54  ;;  %v1443_v56 = vsel %vm445_vm11, %v3451_v54, 0.0  ;;  %v1412_v58 = vsel %vm445_vm11, 0.0, %v3453_v55  ;;  %v1444_v59 = vsel %vm445_vm11, %v3453_v55, 0.0 }
 0x5aa   : > { %v2616_v51 = vpop.permute.xlu1 %2615  ;;  %v2719_v60 = vpack.i.bf16 %v1443_v56, %v1411_v47  ;;  %v2739_v63 = vpack.i.bf16 %v1444_v59, %v1412_v58  ;;  %v2245_v58 = vpack.c.bf16 %v3453_v55, %v3451_v54 }
 0x5ab   : > { %v3467_v62 = vunpack.i.l.bf16 %v2616_v51  ;;  %v3469_v30 = vunpack.i.h.bf16 %v2616_v51 }
 0x5ac   : > { %2690 = vrot.lane.b32.xlu0 %v2689_v52, %s3033_s11  ;;  %2710 = vrot.lane.b32.xlu1 %v2709_v33, %s3033_s11 }
 0x5ad   : > { %v1409_v2 = vsel %vm445_vm11, 0.0, %v3467_v62  ;;  %v1441_v3 = vsel %vm445_vm11, %v3467_v62, 0.0  ;;  %v1410_v4 = vsel %vm445_vm11, 0.0, %v3469_v30  ;;  %v1442_v41 = vsel %vm445_vm11, %v3469_v30, 0.0 }
 0x5ae   : > { %v2621_v29 = vpop.permute.xlu1 %2620  ;;  %v2729_v42 = vpack.i.bf16 %v1441_v3, %v1409_v2  ;;  %v2749_v11 = vpack.i.bf16 %v1442_v41, %v1410_v4 }
 0x5af   : > { %v3499_v10 = vunpack.i.l.bf16 %v2621_v29  ;;  %v3501_v12 = vunpack.i.h.bf16 %v2621_v29 }
 0x5b0   : > { %2695 = vrot.lane.b32.xlu0 %v2689_v52, %s3035_s13  ;;  %2715 = vrot.lane.b32.xlu1 %v2709_v33, %s3035_s13  ;;  %v2240_v33 = vpack.c.bf16 %v3469_v30, %v3467_v62 }
 0x5b1   : > { %v1415_v13 = vsel %vm445_vm11, 0.0, %v3499_v10  ;;  %v1447_v15 = vsel %vm445_vm11, %v3499_v10, 0.0  ;;  %v1416_v16 = vsel %vm445_vm11, 0.0, %v3501_v12  ;;  %v1448_v17 = vsel %vm445_vm11, %v3501_v12, 0.0 }
 0x5b2   : > { %v2626_v34 = vpop.permute.xlu1 %2625  ;;  %v2759_v18 = vpack.i.bf16 %v1447_v15, %v1415_v13  ;;  %v2779_v20 = vpack.i.bf16 %v1448_v17, %v1416_v16 }
 0x5b3   : > { %v3515_v31 = vunpack.i.l.bf16 %v2626_v34  ;;  %v3521_v21 = vunpack.i.h.bf16 %v2626_v34 }
 0x5b4   : > { %2720 = vrot.lane.b32.xlu0 %v2719_v60, %s3033_s11  ;;  %2740 = vrot.lane.b32.xlu1 %v2739_v63, %s3033_s11 }
 0x5b5   : > { %v1413_v32 = vsel %vm445_vm11, 0.0, %v3515_v31  ;;  %v1445_v35 = vsel %vm445_vm11, %v3515_v31, 0.0  ;;  %v1414_v44 = vsel %vm445_vm11, 0.0, %v3521_v21  ;;  %v1446_v26 = vsel %vm445_vm11, %v3521_v21, 0.0 }
 0x5b6   : > { %v2631_v40 = vpop.permute.xlu1 %2630  ;;  %v2769_v48 = vpack.i.bf16 %v1445_v35, %v1413_v32  ;;  %v2789_v50 = vpack.i.bf16 %v1446_v26, %v1414_v44  ;;  %v2250_v41 = vpack.c.bf16 %v3521_v21, %v3515_v31 }
 0x5b7   : > { %v3473_v0 = vunpack.i.h.bf16 %v2631_v40  ;;  %v3475_v1 = vunpack.i.l.bf16 %v2631_v40 }
 0x5b8   : > { %2725 = vrot.lane.b32.xlu0 %v2719_v60, %s3035_s13  ;;  %2745 = vrot.lane.b32.xlu1 %v2739_v63, %s3035_s13 }
 0x5b9   : > { %v1420_v5 = vsel %vm445_vm11, 0.0, %v3473_v0  ;;  %v1452_v37 = vsel %vm445_vm11, %v3473_v0, 0.0  ;;  %v1419_v6 = vsel %vm445_vm11, 0.0, %v3475_v1  ;;  %v1451_v7 = vsel %vm445_vm11, %v3475_v1, 0.0 }
 0x5ba   : > { %v3495_v8 = vpack.i.bf16 %v1452_v37, %v1420_v5  ;;  %v3497_v9 = vpack.i.bf16 %v1451_v7, %v1419_v6  ;;  %v2636_v39 = vpop.permute.xlu1 %2635  ;;  %v2255_v6 = vpack.c.bf16 %v3501_v12, %v3499_v10 }
 0x5bb   : > { %v2637_v29 = vunpack.i.l.bf16 %v2636_v39  ;;  %v2638_v47 = vunpack.i.h.bf16 %v2636_v39 }
 0x5bc   : > { %2730 = vrot.lane.b32.xlu0 %v2729_v42, %s3033_s11  ;;  %2750 = vrot.lane.b32.xlu1 %v2749_v11, %s3033_s11 }
 0x5bd   : > { %v1417_v34 = vsel %vm445_vm11, 0.0, %v2637_v29  ;;  %v1449_v60 = vsel %vm445_vm11, %v2637_v29, 0.0  ;;  %v1418_v30 = vsel %vm445_vm11, 0.0, %v2638_v47  ;;  %v1450_v40 = vsel %vm445_vm11, %v2638_v47, 0.0 }
 0x5be   : > { %v2641_v38 = vpop.permute.xlu0 %2640  ;;  %v2804_v54 = vpack.i.bf16 %v1449_v60, %v1417_v34  ;;  %v2819_v5 = vpack.i.bf16 %v1450_v40, %v1418_v30 }
 0x5bf   : > { %v3523_v22 = vunpack.i.h.bf16 %v2641_v38  ;;  %v3525_v27 = vunpack.i.l.bf16 %v2641_v38 }
 0x5c0   : > { %2735 = vrot.lane.b32.xlu0 %v2729_v42, %s3035_s13  ;;  %2755 = vrot.lane.b32.xlu1 %v2749_v11, %s3035_s13 }
 0x5c1   : > { %v2275_v36 = vpack.c.bf16 %v3523_v22, %v3525_v27  ;;  %v1423_v42 = vsel %vm445_vm11, 0.0, %v3525_v27  ;;  %v1455_v11 = vsel %vm445_vm11, %v3525_v27, 0.0  ;;  %v1424_v15 = vsel %vm445_vm11, 0.0, %v3523_v22 }
 0x5c2   : > { %v2646_v14 = vpop.permute.xlu0 %2645  ;;  %v1456_v10 = vsel %vm445_vm11, %v3523_v22, 0.0  ;;  %v2829_v17 = vpack.i.bf16 %v1455_v11, %v1423_v42  ;;  %v2265_v27 = vpack.c.bf16 %v3473_v0, %v3475_v1 }
 0x5c3   : > { %v3517_v19 = vunpack.i.h.bf16 %v2646_v14  ;;  %v3519_v57 = vunpack.i.l.bf16 %v2646_v14  ;;  %v2849_v31 = vpack.i.bf16 %v1456_v10, %v1424_v15 }
 0x5c4   : > { %2760 = vrot.lane.b32.xlu0 %v2759_v18, %s3033_s11  ;;  %2780 = vrot.lane.b32.xlu1 %v2779_v20, %s3033_s11 }
 0x5c5   : > { %v2270_v46 = vpack.c.bf16 %v3517_v19, %v3519_v57  ;;  %v1454_v32 = vsel %vm445_vm11, %v3517_v19, 0.0 }
 0x5c6   : > { %v2651_v28 = vpop.permute.xlu0 %2650 }
 0x5c7   : > { %2342 = vmatprep.subr.msk.bf16.mxu0 %vm3122_vm13, %v2270_v46  ;;  %v3557_v51 = vunpack.i.h.bf16 %v2651_v28  ;;  %v3559_v52 = vunpack.i.l.bf16 %v2651_v28  ;;  %v1421_v46 = vsel %vm445_vm11, 0.0, %v3519_v57  ;;  %v1453_v28 = vsel %vm445_vm11, %v3519_v57, 0.0 }
 0x5c8   : > { %2765 = vrot.lane.b32.xlu0 %v2759_v18, %s3035_s13  ;;  %2785 = vrot.lane.b32.xlu1 %v2779_v20, %s3035_s13  ;;  %v2260_v18 = vpack.c.bf16 %v2638_v47, %v2637_v29  ;;  %v1274_v20 = vld [vmem:[%s3967_s7] sm:$0xff]  ;;  %v2839_v0 = vpack.i.bf16 %v1453_v28, %v1421_v46 }
 0x5c9   : > { %2343 = vmatpush3.bf16.msk.msra.mxu0 %vm3122_vm13, %v2230_v23  ;;  %v2285_v56 = vpack.c.bf16 %v3557_v51, %v3559_v52  ;;  %v2222_v22 = vcombine.high %v1274_v20, %v1274_v20  ;;  %v1422_v23 = vsel %vm445_vm11, 0.0, %v3517_v19  ;;  %v2221_v35 = vcombine.low %v1274_v20, %v1274_v20 }
 0x5ca   : > { %2344 = vmatprep.subr.msk.bf16.mxu0 %vm3122_vm13, %v2275_v36  ;;  %v2656_v45 = vpop.permute.xlu0 %2655  ;;  %v2859_v1 = vpack.i.bf16 %v1454_v32, %v1422_v23  ;;  %v1427_v57 = vsel %vm445_vm11, 0.0, %v3559_v52  ;;  %v1459_v19 = vsel %vm445_vm11, %v3559_v52, 0.0  ;;  %v1428_v36 = vsel %vm445_vm11, 0.0, %v3557_v51 }
 0x5cb   : > { %v3553_v24 = vunpack.i.h.bf16 %v2656_v45  ;;  %v3555_v43 = vunpack.i.l.bf16 %v2656_v45  ;;  %2018 = vmatprep.mubr.bf16.mxu0 %v2222_v22  ;;  %v1460_v53 = vsel %vm445_vm11, %v3557_v51, 0.0  ;;  %v2869_v44 = vpack.i.bf16 %v1459_v19, %v1427_v57 }
 0x5cc   : > { %2770 = vrot.lane.b32.xlu0 %v2769_v48, %s3033_s11  ;;  %2790 = vrot.lane.b32.xlu1 %v2789_v50, %s3033_s11  ;;  %v2889_v26 = vpack.i.bf16 %v1460_v53, %v1428_v36 }
 0x5cd   : > { %2345 = vmatpush3.bf16.msk.msra.mxu0 %vm3122_vm13, %v2235_v49  ;;  %v2280_v25 = vpack.c.bf16 %v3553_v24, %v3555_v43  ;;  %v1425_v45 = vsel %vm445_vm11, 0.0, %v3555_v43  ;;  %v1426_v49 = vsel %vm445_vm11, 0.0, %v3553_v24 }
 0x5ce   : > { %v2661_v61 = vpop.permute.xlu0 %2660 }
 0x5cf   : > { %2346 = vmatprep.subr.msk.bf16.mxu0 %vm3122_vm13, %v2280_v25  ;;  %v3589_v2 = vunpack.i.h.bf16 %v2661_v61  ;;  %v3591_v3 = vunpack.i.l.bf16 %v2661_v61 }
 0x5d0   : > { %2775 = vrot.lane.b32.xlu0 %v2769_v48, %s3035_s13  ;;  %2795 = vrot.lane.b32.xlu1 %v2789_v50, %s3035_s13  ;;  %v1457_v48 = vsel %vm445_vm11, %v3555_v43, 0.0  ;;  %v1458_v50 = vsel %vm445_vm11, %v3553_v24, 0.0 }
 0x5d1   : > { %2347 = vmatpush3.bf16.msk.msra.mxu0 %vm3122_vm13, %v2240_v33  ;;  %v2295_v37 = vpack.c.bf16 %v3589_v2, %v3591_v3  ;;  %v2879_v39 = vpack.i.bf16 %v1457_v48, %v1425_v45  ;;  %v2899_v51 = vpack.i.bf16 %v1458_v50, %v1426_v49  ;;  %v1431_v52 = vsel %vm445_vm11, 0.0, %v3591_v3 }
 0x5d2   : > { %2348 = vmatprep.subr.msk.bf16.mxu0 %vm3122_vm13, %v2285_v56  ;;  %v2666_v59 = vpop.permute.xlu0 %2665  ;;  %v1463_v43 = vsel %vm445_vm11, %v3591_v3, 0.0  ;;  %v1432_v25 = vsel %vm445_vm11, 0.0, %v3589_v2  ;;  %v1464_v24 = vsel %vm445_vm11, %v3589_v2, 0.0 }
 0x5d3   : > { %v3583_v62 = vunpack.i.h.bf16 %v2666_v59  ;;  %v3585_v63 = vunpack.i.l.bf16 %v2666_v59  ;;  %v2909_v61 = vpack.i.bf16 %v1463_v43, %v1431_v52  ;;  %v2929_v33 = vpack.i.bf16 %v1464_v24, %v1432_v25 }
 0x5d4   : > { %2800 = vrot.lane.b32.xlu0 %v3497_v9, %s3033_s11  ;;  %2815 = vrot.lane.b32.xlu1 %v3495_v8, %s3033_s11 }
 0x5d5   : > { %2349 = vmatpush3.bf16.msk.msra.mxu0 %vm3122_vm13, %v2245_v58  ;;  %v2290_v55 = vpack.c.bf16 %v3583_v62, %v3585_v63  ;;  %v1429_v29 = vsel %vm445_vm11, 0.0, %v3585_v63  ;;  %v1461_v47 = vsel %vm445_vm11, %v3585_v63, 0.0  ;;  %v1430_v56 = vsel %vm445_vm11, 0.0, %v3583_v62 }
 0x5d6   : > { %v2671_v4 = vpop.permute.xlu0 %2670  ;;  %v1462_v58 = vsel %vm445_vm11, %v3583_v62, 0.0  ;;  %v2919_v59 = vpack.i.bf16 %v1461_v47, %v1429_v29 }
 0x5d7   : > { %2350 = vmatprep.subr.msk.bf16.mxu0 %vm3122_vm13, %v2290_v55  ;;  %v3627_v12 = vunpack.i.h.bf16 %v2671_v4  ;;  %v3629_v16 = vunpack.i.l.bf16 %v2671_v4  ;;  %v2939_v34 = vpack.i.bf16 %v1462_v58, %v1430_v56 }
 0x5d8   : > { %2805 = vrot.lane.b32.xlu0 %v2804_v54, %s3033_s11  ;;  %2820 = vrot.lane.b32.xlu1 %v2819_v5, %s3033_s11 }
 0x5d9   : > { %2351 = vmatpush3.bf16.msk.msra.mxu0 %vm3122_vm13, %v2250_v41  ;;  %v2305_v21 = vpack.c.bf16 %v3627_v12, %v3629_v16  ;;  %v1435_v60 = vsel %vm445_vm11, 0.0, %v3629_v16  ;;  %v1467_v63 = vsel %vm445_vm11, %v3629_v16, 0.0  ;;  %v1436_v30 = vsel %vm445_vm11, 0.0, %v3627_v12 }
 0x5da   : > { %2352 = vmatprep.subr.msk.bf16.mxu0 %vm3122_vm13, %v2295_v37  ;;  %v2676_v7 = vpop.permute.xlu0 %2675  ;;  %v1468_v62 = vsel %vm445_vm11, %v3627_v12, 0.0  ;;  %v2949_v40 = vpack.i.bf16 %v1467_v63, %v1435_v60  ;;  %v3751_v12 = vld [vmem:[%s3967_s7 + $0x10] sm:$0xff] }
 0x5db   : > { %v3619_v38 = vunpack.i.h.bf16 %v2676_v7  ;;  %v3621_v13 = vunpack.i.l.bf16 %v2676_v7  ;;  %v2969_v2 = vpack.i.bf16 %v1468_v62, %v1436_v30 }
 0x5dc   : > { %2810 = vrot.lane.b32.xlu0 %v2804_v54, %s3035_s13  ;;  %2825 = vrot.lane.b32.xlu1 %v2819_v5, %s3035_s13  ;;  %v3737_v5 = vld [vmem:[%s3967_s7 + $0x8] sm:$0xff] }
 0x5dd   : > { %2353 = vmatpush3.bf16.msk.msra.mxu0 %vm3122_vm13, %v2255_v6  ;;  %v2300_v14 = vpack.c.bf16 %v3619_v38, %v3621_v13  ;;  %v1433_v3 = vsel %vm445_vm11, 0.0, %v3621_v13  ;;  %v1465_v54 = vsel %vm445_vm11, %v3621_v13, 0.0  ;;  %v1434_v55 = vsel %vm445_vm11, 0.0, %v3619_v38 }
 0x5de   : > { %v1466_v4 = vsel %vm445_vm11, %v3619_v38, 0.0  ;;  %v2954_v41 = vpack.i.bf16 %v1465_v54, %v1433_v3  ;;  %v2224_v6 = vcombine.high %v3737_v5, %v3737_v5 }
 0x5df   : > { %2354 = vmatprep.subr.msk.bf16.mxu0 %vm3122_vm13, %v2300_v14  ;;  %v2974_v37 = vpack.i.bf16 %v1466_v4, %v1434_v55  ;;  %v2226_v14 = vcombine.high %v3751_v12, %v3751_v12 }
 0x5e0   : > { %2830 = vrot.lane.b32.xlu0 %v2829_v17, %s3033_s11  ;;  %2850 = vrot.lane.b32.xlu1 %v2849_v31, %s3033_s11 }
 0x5e1   : > { %2355 = vmatpush3.bf16.msk.msra.mxu0 %vm3122_vm13, %v2260_v18  ;;  %2098 = vmatprep.mubr.bf16.mxu1 %v2226_v14 }
 0x5e2   : > { %2356 = vmatprep.subr.msk.bf16.mxu0 %vm3122_vm13, %v2305_v21 }
 0x5e4   : > { %2835 = vrot.lane.b32.xlu0 %v2829_v17, %s3035_s13  ;;  %2855 = vrot.lane.b32.xlu1 %v2849_v31, %s3035_s13 }
 0x5e5   : > { %2357 = vmatpush3.bf16.msk.msra.mxu0 %vm3122_vm13, %v2265_v27 }
 0x5e8   : > { %2840 = vrot.lane.b32.xlu0 %v2839_v0, %s3033_s11  ;;  %2019 = vmatmul.mubr.bf16.vlgmr.msra.gmra.mrb[8].mxu0 %v2221_v35 }
 0x5e9   : > { %2860 = vrot.lane.b32.xlu1 %v2859_v1, %s3033_s11  ;;  %2058 = vmatprep.mubr.bf16.mxu0 %v2224_v6 }
 0x5ec   : > { %2845 = vrot.lane.b32.xlu0 %v2839_v0, %s3035_s13 }
 0x5ed   : > { %2865 = vrot.lane.b32.xlu1 %v2859_v1, %s3035_s13 }
 0x5f0   : > { %2870 = vrot.lane.b32.xlu0 %v2869_v44, %s3033_s11 }
 0x5f1   : > { %2890 = vrot.lane.b32.xlu1 %v2889_v26, %s3033_s11 }
 0x5f4   : > { %2875 = vrot.lane.b32.xlu0 %v2869_v44, %s3035_s13 }
 0x5f5   : > { %2895 = vrot.lane.b32.xlu1 %v2889_v26, %s3035_s13 }
 0x5f8   : > { %2880 = vrot.lane.b32.xlu0 %v2879_v39, %s3033_s11 }
 0x5f9   : > { %2900 = vrot.lane.b32.xlu1 %v2899_v51, %s3033_s11 }
 0x5fc   : > { %2885 = vrot.lane.b32.xlu0 %v2879_v39, %s3035_s13 }
 0x5fd   : > { %2905 = vrot.lane.b32.xlu1 %v2899_v51, %s3035_s13 }
 0x600   : > { %2910 = vrot.lane.b32.xlu0 %v2909_v61, %s3033_s11 }
 0x601   : > { %2930 = vrot.lane.b32.xlu1 %v2929_v33, %s3033_s11 }
 0x604   : > { %2915 = vrot.lane.b32.xlu0 %v2909_v61, %s3035_s13 }
 0x605   : > { %2935 = vrot.lane.b32.xlu1 %v2929_v33, %s3035_s13 }
 0x608   : > { %2920 = vrot.lane.b32.xlu0 %v2919_v59, %s3033_s11 }
 0x609   : > { %2940 = vrot.lane.b32.xlu1 %v2939_v34, %s3033_s11 }
 0x60c   : > { %2925 = vrot.lane.b32.xlu0 %v2919_v59, %s3035_s13 }
 0x60d   : > { %2945 = vrot.lane.b32.xlu1 %v2939_v34, %s3035_s13 }
 0x610   : > { %2950 = vrot.lane.b32.xlu0 %v2949_v40, %s3033_s11 }
 0x611   : > { %2970 = vrot.lane.b32.xlu1 %v2969_v2, %s3033_s11 }
 0x614   : > { %2955 = vrot.lane.b32.xlu0 %v2954_v41, %s3033_s11 }
 0x615   : > { %2975 = vrot.lane.b32.xlu1 %v2974_v37, %s3033_s11  ;;  %s2167_s11 = sshll.u32 %s3976_s28, 3 }
 0x616   : > { %v2681_v7 = vpop.permute.xlu0 %2680  ;;  %v2701_v38 = vpop.permute.xlu1 %2700  ;;  %s303_s18 = scalar_lea.vmem %s3968_s8, %s2167_s11 }
 0x617   : > { %v2683_v42 = vunpack.i.h.bf16 %v2681_v7  ;;  %v2682_v11 = vunpack.i.l.bf16 %v2681_v7  ;;  %v2703_v13 = vunpack.i.h.bf16 %v2701_v38  ;;  %v2702_v15 = vunpack.i.l.bf16 %v2701_v38 }
 0x618   : > { %2960 = vrot.lane.b32.xlu0 %v2954_v41, %s3035_s13 }
 0x619   : > { %v3745_v10 = vsel %vm317_vm1, %v2682_v11, %v2683_v42  ;;  %2980 = vrot.lane.b32.xlu1 %v2974_v37, %s3035_s13  ;;  %v3754_v16 = vsel %vm317_vm1, %v2702_v15, %v2703_v13 }
 0x61a   : > { %v2686_v17 = vpop.permute.xlu0 %2685  ;;  %v1934_v18 = vpack.c.bf16 %v3754_v16, %v3745_v10  ;;  %v2706_v21 = vpop.permute.xlu1 %2705 }
 0x61b   : > { %v2688_v31 = vunpack.i.h.bf16 %v2686_v17  ;;  %v2687_v20 = vunpack.i.l.bf16 %v2686_v17  ;;  %v2708_v22 = vunpack.i.h.bf16 %v2706_v21  ;;  %v2707_v27 = vunpack.i.l.bf16 %v2706_v21 }
 0x61c   : > { %2965 = vrot.lane.b32.xlu0 %v2949_v40, %s3035_s13 }
 0x61d   : > { %v3762_v46 = vsel %vm324_vm3, %v2687_v20, %v2688_v31  ;;  %2985 = vrot.lane.b32.xlu1 %v2969_v2, %s3035_s13  ;;  %v3766_v28 = vsel %vm324_vm3, %v2707_v27, %v2708_v22 }
 0x61e   : > { %v3768_v23 = vpop.permute.xlu0 %2690  ;;  %v1950_v32 = vpack.c.bf16 %v3766_v28, %v3762_v46  ;;  %v3772_v35 = vpop.permute.xlu1 %2710 }
 0x620   : > { %2990 = vrot.lane.b32.xlu0 %v3497_v9, %s3035_s13 }
 0x621   : > { %2995 = vrot.lane.b32.xlu1 %v3495_v8, %s3035_s13 }
 0x622   : > { %v3778_v0 = vpop.permute.xlu0 %2695  ;;  %v3780_v1 = vpop.permute.xlu1 %2715 }
 0x626   : > { %v2721_v57 = vpop.permute.xlu0 %2720  ;;  %v2741_v19 = vpop.permute.xlu1 %2740 }
 0x627   : > { %v2723_v36 = vunpack.i.h.bf16 %v2721_v57  ;;  %v2722_v53 = vunpack.i.l.bf16 %v2721_v57  ;;  %v2743_v44 = vunpack.i.h.bf16 %v2741_v19  ;;  %v2742_v26 = vunpack.i.l.bf16 %v2741_v19 }
 0x629   : > { %v3783_v45 = vsel %vm317_vm1, %v2722_v53, %v2723_v36  ;;  %v3786_v48 = vsel %vm317_vm1, %v2742_v26, %v2743_v44 }
 0x62a   : > { %v2726_v9 = vpop.permute.xlu0 %2725  ;;  %v1936_v8 = vpack.c.bf16 %v3786_v48, %v3783_v45  ;;  %v2746_v49 = vpop.permute.xlu1 %2745 }
 0x62b   : > { %v2728_v50 = vunpack.i.h.bf16 %v2726_v9  ;;  %v2727_v39 = vunpack.i.l.bf16 %v2726_v9  ;;  %v2748_v51 = vunpack.i.h.bf16 %v2746_v49  ;;  %v2747_v52 = vunpack.i.l.bf16 %v2746_v49 }
 0x62c   : > { %v2713_v49 = vunpack.i.h.bf16 %v3772_v35 }
 0x62d   : > { %v3791_v43 = vsel %vm324_vm3, %v2727_v39, %v2728_v50  ;;  %v3794_v25 = vsel %vm324_vm3, %v2747_v52, %v2748_v51  ;;  %v2712_v50 = vunpack.i.l.bf16 %v3772_v35  ;;  %v2693_v39 = vunpack.i.h.bf16 %v3768_v23 }
 0x62e   : > { %v3796_v24 = vpop.permute.xlu0 %2730  ;;  %v3800_v33 = vpop.permute.xlu1 %2750  ;;  %v2692_v51 = vunpack.i.l.bf16 %v3768_v23  ;;  %v2718_v23 = vunpack.i.h.bf16 %v3780_v1 }
 0x632   : > { %v3802_v29 = vpop.permute.xlu0 %2735  ;;  %v3804_v47 = vpop.permute.xlu1 %2755 }
 0x633   : > { %v2738_v10 = vunpack.i.h.bf16 %v3802_v29  ;;  %v2737_v16 = vunpack.i.l.bf16 %v3802_v29 }
 0x636   : > { %v2761_v56 = vpop.permute.xlu0 %2760  ;;  %v2781_v58 = vpop.permute.xlu1 %2780 }
 0x637   : > { %v2763_v59 = vunpack.i.h.bf16 %v2761_v56  ;;  %v2762_v34 = vunpack.i.l.bf16 %v2761_v56  ;;  %v2783_v60 = vunpack.i.h.bf16 %v2781_v58  ;;  %v2782_v63 = vunpack.i.l.bf16 %v2781_v58 }
 0x639   : > { %v3807_v30 = vsel %vm317_vm1, %v2762_v34, %v2763_v59  ;;  %v3810_v62 = vsel %vm317_vm1, %v2782_v63, %v2783_v60  ;;  %v1662_v63 = vsel %vm317_vm1, %v2712_v50, %v2713_v49 }
 0x63a   : > { %v2766_v40 = vpop.permute.xlu0 %2765  ;;  %v2786_v3 = vpop.permute.xlu1 %2785 }
 0x63b   : > { %v2768_v54 = vunpack.i.h.bf16 %v2766_v40  ;;  %v2767_v55 = vunpack.i.l.bf16 %v2766_v40  ;;  %v2788_v4 = vunpack.i.h.bf16 %v2786_v3  ;;  %v2787_v41 = vunpack.i.l.bf16 %v2786_v3 }
 0x63c   : > { %v1661_v40 = vsel %vm317_vm1, %v2692_v51, %v2693_v39 }
 0x63d   : > { %v3815_v37 = vsel %vm324_vm3, %v2767_v55, %v2768_v54  ;;  %v3818_v6 = vsel %vm324_vm3, %v2787_v41, %v2788_v4  ;;  %v2698_v54 = vunpack.i.h.bf16 %v3778_v0  ;;  %v2697_v55 = vunpack.i.l.bf16 %v3778_v0 }
 0x63e   : > { %v3820_v7 = vpop.permute.xlu0 %2770  ;;  %v3824_v11 = vpop.permute.xlu1 %2790 }
 0x642   : > { %v3826_v38 = vpop.permute.xlu0 %2775  ;;  %v3828_v13 = vpop.permute.xlu1 %2795 }
 0x643   : > { %v2778_v45 = vunpack.i.h.bf16 %v3826_v38  ;;  %v2777_v48 = vunpack.i.l.bf16 %v3826_v38 }
 0x646   : > { %v2801_v15 = vpop.permute.xlu0 %2800  ;;  %v2816_v17 = vpop.permute.xlu1 %2815 }
 0x647   : > { %v2803_v14 = vunpack.i.h.bf16 %v2801_v15  ;;  %v2802_v31 = vunpack.i.l.bf16 %v2801_v15  ;;  %v2818_v20 = vunpack.i.h.bf16 %v2816_v17  ;;  %v2817_v21 = vunpack.i.l.bf16 %v2816_v17 }
 0x648   : > { %v2717_v15 = vunpack.i.l.bf16 %v3780_v1  ;;  %v1933_v1 = vpack.c.bf16 %v1662_v63, %v1661_v40 }
 0x649   : > { %v3831_v22 = vsel %vm317_vm1, %v2802_v31, %v2803_v14  ;;  %v3834_v27 = vsel %vm317_vm1, %v2817_v21, %v2818_v20 }
 0x64a   : > { %v3836_v57 = vpop.permute.xlu0 %2805  ;;  %v3840_v36 = vpop.permute.xlu1 %2820  ;;  %v1854_v61 = vsel %vm324_vm3, %v2717_v15, %v2718_v23 }
 0x64e   : > { %v3842_v53 = vpop.permute.xlu0 %2810  ;;  %v3844_v44 = vpop.permute.xlu1 %2825 }
 0x652   : > { %v2831_v26 = vpop.permute.xlu0 %2830  ;;  %v2851_v9 = vpop.permute.xlu1 %2850 }
 0x653   : > { %v2853_v58 = vunpack.i.h.bf16 %v2851_v9  ;;  %v2852_v59 = vunpack.i.l.bf16 %v2851_v9  ;;  %v2833_v34 = vunpack.i.h.bf16 %v2831_v26  ;;  %v2832_v60 = vunpack.i.l.bf16 %v2831_v26 }
 0x655   : > { %v1679_v21 = vsel %vm317_vm1, %v2832_v60, %v2833_v34  ;;  %v1680_v26 = vsel %vm317_vm1, %v2852_v59, %v2853_v58 }
 0x656   : > { %v2836_v52 = vpop.permute.xlu0 %2835  ;;  %v2856_v56 = vpop.permute.xlu1 %2855  ;;  %v1942_v34 = vpack.c.bf16 %v1680_v26, %v1679_v21 }
 0x657   : > { %v2838_v31 = vunpack.i.h.bf16 %v2836_v52  ;;  %v2858_v9 = vunpack.i.h.bf16 %v2856_v56  ;;  %v2857_v49 = vunpack.i.l.bf16 %v2856_v56  ;;  %v2837_v50 = vunpack.i.l.bf16 %v2836_v52 }
 0x659   : > { %v1871_v59 = vsel %vm324_vm3, %v2837_v50, %v2838_v31  ;;  %v1872_v60 = vsel %vm324_vm3, %v2857_v49, %v2858_v9  ;;  %v2758_v9 = vunpack.i.h.bf16 %v3804_v47  ;;  %v2757_v49 = vunpack.i.l.bf16 %v3804_v47 }
 0x65a   : > { %v2841_v3 = vpop.permute.xlu0 %2840  ;;  %v1958_v23 = vpack.c.bf16 %v1872_v60, %v1871_v59 }
 0x65b   : > { %v2861_v35 = vpop.permute.xlu1 %2860  ;;  %v2843_v4 = vunpack.i.h.bf16 %v2841_v3  ;;  %v2842_v41 = vunpack.i.l.bf16 %v2841_v3  ;;  %v1858_v60 = vsel %vm324_vm3, %v2757_v49, %v2758_v9  ;;  %v3971_v9 = vpack.c.bf16 %v3794_v25, %v3791_v43 }
 0x65c   : > { %v2863_v17 = vunpack.i.h.bf16 %v2861_v35  ;;  %v2862_v14 = vunpack.i.l.bf16 %v2861_v35 }
 0x65d   : > { %v1677_v20 = vsel %vm317_vm1, %v2842_v41, %v2843_v4  ;;  %v1853_v4 = vsel %vm324_vm3, %v2697_v55, %v2698_v54  ;;  %v2753_v54 = vunpack.i.h.bf16 %v3800_v33  ;;  %v2732_v55 = vunpack.i.l.bf16 %v3796_v24 }
 0x65e   : > { %v2846_v0 = vpop.permute.xlu0 %2845  ;;  %v1678_v39 = vsel %vm317_vm1, %v2862_v14, %v2863_v17  ;;  %v1949_v40 = vpack.c.bf16 %v1854_v61, %v1853_v4 }
 0x65f   : > { %v2866_v51 = vpop.permute.xlu1 %2865  ;;  %v2848_v3 = vunpack.i.h.bf16 %v2846_v0  ;;  %v2847_v19 = vunpack.i.l.bf16 %v2846_v0  ;;  %v1941_v42 = vpack.c.bf16 %v1678_v39, %v1677_v20 }
 0x660   : > { %v2868_v2 = vunpack.i.h.bf16 %v2866_v51  ;;  %v2867_v35 = vunpack.i.l.bf16 %v2866_v51 }
 0x661   : > { %2364 = vmatprep.subr.bf16.mxu0 %v1941_v42  ;;  %v1869_v58 = vsel %vm324_vm3, %v2847_v19, %v2848_v3  ;;  %v2752_v42 = vunpack.i.l.bf16 %v3800_v33  ;;  %v2733_v19 = vunpack.i.h.bf16 %v3796_v24 }
 0x662   : > { %2365 = vmatpush3.bf16.msra.mxu0 %v1933_v1  ;;  %v2871_v52 = vpop.permute.xlu0 %2870  ;;  %v1870_v56 = vsel %vm324_vm3, %v2867_v35, %v2868_v2 }
 0x663   : > { %v2891_v41 = vpop.permute.xlu1 %2890  ;;  %2366 = vmatprep.subr.bf16.mxu0 %v1942_v34  ;;  %v1957_v63 = vpack.c.bf16 %v1870_v56, %v1869_v58  ;;  %v2873_v14 = vunpack.i.h.bf16 %v2871_v52  ;;  %v2872_v31 = vunpack.i.l.bf16 %v2871_v52  ;;  %v1666_v20 = vsel %vm317_vm1, %v2752_v42, %v2753_v54 }
 0x664   : > { %v2893_v17 = vunpack.i.h.bf16 %v2891_v41  ;;  %v2892_v61 = vunpack.i.l.bf16 %v2891_v41  ;;  %v1665_v33 = vsel %vm317_vm1, %v2732_v55, %v2733_v19  ;;  %v1857_v41 = vsel %vm324_vm3, %v2737_v16, %v2738_v10 }
 0x665   : > { %2386 = vmatprep.subr.bf16.mxu1 %v1957_v63  ;;  %v1683_v46 = vsel %vm317_vm1, %v2872_v31, %v2873_v14  ;;  %v1935_v47 = vpack.c.bf16 %v1666_v20, %v1665_v33  ;;  %v2792_v14 = vunpack.i.l.bf16 %v3824_v11  ;;  %v2773_v31 = vunpack.i.h.bf16 %v3820_v7 }
 0x666   : > { %2367 = vmatpush3.bf16.msra.mxu0 %v1934_v18  ;;  %2387 = vmatpush3.bf16.msra.mxu1 %v1949_v40  ;;  %v2876_v2 = vpop.permute.xlu0 %2875  ;;  %v1684_v28 = vsel %vm317_vm1, %v2892_v61, %v2893_v17  ;;  %v2793_v61 = vunpack.i.h.bf16 %v3824_v11  ;;  %v2772_v20 = vunpack.i.l.bf16 %v3820_v7 }
 0x667   : > { %v2896_v15 = vpop.permute.xlu1 %2895  ;;  %2388 = vmatprep.subr.bf16.mxu1 %v1958_v23  ;;  %v2878_v39 = vunpack.i.h.bf16 %v2876_v2  ;;  %v2877_v1 = vunpack.i.l.bf16 %v2876_v2  ;;  %v1944_v63 = vpack.c.bf16 %v1684_v28, %v1683_v46 }
 0x668   : > { %v2897_v3 = vunpack.i.l.bf16 %v2896_v15  ;;  %v1669_v11 = vsel %vm317_vm1, %v2772_v20, %v2773_v31 }
 0x669   : > { %v1875_v42 = vsel %vm324_vm3, %v2877_v1, %v2878_v39  ;;  %v2797_v39 = vunpack.i.l.bf16 %v3828_v13 }
 0x66a   : > { %2389 = vmatpush3.bf16.msra.mxu1 %v1950_v32  ;;  %v2881_v24 = vpop.permute.xlu0 %2880  ;;  %v2898_v32 = vunpack.i.h.bf16 %v2896_v15  ;;  %v1951_v15 = vpack.c.bf16 %v1858_v60, %v1857_v41  ;;  %v1861_v60 = vsel %vm324_vm3, %v2777_v48, %v2778_v45  ;;  %v2828_v48 = vunpack.i.h.bf16 %v3844_v44 }
 0x66b   : > { %v2901_v18 = vpop.permute.xlu1 %2900  ;;  %v2883_v21 = vunpack.i.h.bf16 %v2881_v24  ;;  %v2882_v26 = vunpack.i.l.bf16 %v2881_v24 }
 0x66c   : > { %v2903_v50 = vunpack.i.h.bf16 %v2901_v18  ;;  %v2902_v0 = vunpack.i.l.bf16 %v2901_v18  ;;  %v1876_v19 = vsel %vm324_vm3, %v2897_v3, %v2898_v32 }
 0x66d   : > { %v1681_v51 = vsel %vm317_vm1, %v2882_v26, %v2883_v21  ;;  %v1960_v17 = vpack.c.bf16 %v1876_v19, %v1875_v42  ;;  %v1670_v26 = vsel %vm317_vm1, %v2792_v14, %v2793_v61  ;;  %v2808_v19 = vunpack.i.h.bf16 %v3836_v57 }
 0x66e   : > { %v2886_v29 = vpop.permute.xlu0 %2885  ;;  %v1682_v35 = vsel %vm317_vm1, %v2902_v0, %v2903_v50  ;;  %v2798_v0 = vunpack.i.h.bf16 %v3828_v13  ;;  %v1937_v13 = vpack.c.bf16 %v1670_v26, %v1669_v11  ;;  %v2823_v61 = vunpack.i.h.bf16 %v3840_v36 }
 0x66f   : > { %v2906_v4 = vpop.permute.xlu1 %2905  ;;  %v2888_v34 = vunpack.i.h.bf16 %v2886_v29  ;;  %v2887_v58 = vunpack.i.l.bf16 %v2886_v29  ;;  %v1943_v52 = vpack.c.bf16 %v1682_v35, %v1681_v51  ;;  %v2822_v14 = vunpack.i.l.bf16 %v3840_v36 }
 0x670   : > { %v2908_v56 = vunpack.i.h.bf16 %v2906_v4  ;;  %v2907_v59 = vunpack.i.l.bf16 %v2906_v4 }
 0x671   : > { %2368 = vmatprep.subr.bf16.mxu0 %v1943_v52  ;;  %v1873_v40 = vsel %vm324_vm3, %v2887_v58, %v2888_v34  ;;  %v1674_v36 = vsel %vm317_vm1, %v2822_v14, %v2823_v61 }
 0x672   : > { %2369 = vmatpush3.bf16.msra.mxu0 %v1935_v47  ;;  %v2911_v23 = vpop.permute.xlu0 %2910  ;;  %v1874_v54 = vsel %vm324_vm3, %v2907_v59, %v2908_v56  ;;  %v1862_v59 = vsel %vm324_vm3, %v2797_v39, %v2798_v0 }
 0x673   : > { %v2931_v55 = vpop.permute.xlu1 %2930  ;;  %2370 = vmatprep.subr.bf16.mxu0 %v1944_v63  ;;  %v1959_v2 = vpack.c.bf16 %v1874_v54, %v1873_v40  ;;  %v2913_v18 = vunpack.i.h.bf16 %v2911_v23  ;;  %v2912_v21 = vunpack.i.l.bf16 %v2911_v23 }
 0x674   : > { %v2933_v10 = vunpack.i.h.bf16 %v2931_v55  ;;  %v2932_v16 = vunpack.i.l.bf16 %v2931_v55  ;;  %v2807_v55 = vunpack.i.l.bf16 %v3836_v57 }
 0x675   : > { %2390 = vmatprep.subr.bf16.mxu1 %v1959_v2  ;;  %v1687_v43 = vsel %vm317_vm1, %v2912_v21, %v2913_v18 }
 0x676   : > { %2371 = vmatpush3.bf16.msra.mxu0 %v1936_v8  ;;  %2391 = vmatpush3.bf16.msra.mxu1 %v1951_v15  ;;  %v2916_v33 = vpop.permute.xlu0 %2915  ;;  %v1688_v25 = vsel %vm317_vm1, %v2932_v16, %v2933_v10  ;;  %v3972_v16 = vpack.c.bf16 %v3810_v62, %v3807_v30  ;;  %v1673_v18 = vsel %vm317_vm1, %v2807_v55, %v2808_v19  ;;  %v2812_v30 = vunpack.i.l.bf16 %v3842_v53 }
 0x677   : > { %v2936_v24 = vpop.permute.xlu1 %2935  ;;  %2392 = vmatprep.subr.bf16.mxu1 %v1960_v17  ;;  %v2918_v28 = vunpack.i.h.bf16 %v2916_v33  ;;  %v2917_v29 = vunpack.i.l.bf16 %v2916_v33  ;;  %v1946_v41 = vpack.c.bf16 %v1688_v25, %v1687_v43  ;;  %v1953_v17 = vpack.c.bf16 %v1862_v59, %v1861_v60 }
 0x678   : > { %v2938_v3 = vunpack.i.h.bf16 %v2936_v24  ;;  %v2937_v1 = vunpack.i.l.bf16 %v2936_v24  ;;  %v3974_v60 = vpack.c.bf16 %v3834_v27, %v3831_v22  ;;  %v2225_v22 = vcombine.low %v3751_v12, %v3751_v12 }
 0x679   : > { %v1879_v54 = vsel %vm324_vm3, %v2917_v29, %v2918_v28 }
 0x67a   : > { %2393 = vmatpush3.bf16.msra.mxu1 %v3971_v9  ;;  %v2921_v7 = vpop.permute.xlu0 %2920  ;;  %v1880_v42 = vsel %vm324_vm3, %v2937_v1, %v2938_v3  ;;  %v2813_v9 = vunpack.i.h.bf16 %v3842_v53 }
 0x67b   : > { %v2941_v8 = vpop.permute.xlu1 %2940  ;;  %v2923_v49 = vunpack.i.h.bf16 %v2921_v7  ;;  %v2922_v50 = vunpack.i.l.bf16 %v2921_v7  ;;  %v1962_v31 = vpack.c.bf16 %v1880_v42, %v1879_v54 }
 0x67c   : > { %v2943_v51 = vunpack.i.h.bf16 %v2941_v8  ;;  %v2942_v46 = vunpack.i.l.bf16 %v2941_v8  ;;  %v2827_v8 = vunpack.i.l.bf16 %v3844_v44  ;;  %v1939_v44 = vpack.c.bf16 %v1674_v36, %v1673_v18 }
 0x67d   : > { %v1685_v32 = vsel %vm317_vm1, %v2922_v50, %v2923_v49  ;;  %v3973_v49 = vpack.c.bf16 %v3818_v6, %v3815_v37  ;;  %v1865_v1 = vsel %vm324_vm3, %v2812_v30, %v2813_v9 }
 0x67e   : > { %v2926_v38 = vpop.permute.xlu0 %2925  ;;  %v1686_v35 = vsel %vm317_vm1, %v2942_v46, %v2943_v51  ;;  %v1866_v3 = vsel %vm324_vm3, %v2827_v8, %v2828_v48 }
 0x67f   : > { %v2946_v4 = vpop.permute.xlu1 %2945  ;;  %v2928_v34 = vunpack.i.h.bf16 %v2926_v38  ;;  %v2927_v58 = vunpack.i.l.bf16 %v2926_v38  ;;  %v1945_v52 = vpack.c.bf16 %v1686_v35, %v1685_v32 }
 0x680   : > { %v2948_v47 = vunpack.i.h.bf16 %v2946_v4  ;;  %v2947_v56 = vunpack.i.l.bf16 %v2946_v4 }
 0x681   : > { %2372 = vmatprep.subr.bf16.mxu0 %v1945_v52  ;;  %v1877_v63 = vsel %vm324_vm3, %v2927_v58, %v2928_v34  ;;  %v1955_v52 = vpack.c.bf16 %v1866_v3, %v1865_v1 }
 0x682   : > { %2373 = vmatpush3.bf16.msra.mxu0 %v1937_v13  ;;  %v2951_v40 = vpop.permute.xlu0 %2950  ;;  %v1878_v23 = vsel %vm324_vm3, %v2947_v56, %v2948_v47  ;;  %v2223_v56 = vcombine.low %v3737_v5, %v3737_v5 }
 0x683   : > { %v2971_v2 = vpop.permute.xlu1 %2970  ;;  %2374 = vmatprep.subr.bf16.mxu0 %v1946_v41  ;;  %v1961_v15 = vpack.c.bf16 %v1878_v23, %v1877_v63  ;;  %v2953_v24 = vunpack.i.h.bf16 %v2951_v40  ;;  %v2952_v10 = vunpack.i.l.bf16 %v2951_v40 }
 0x684   : > { %v2973_v20 = vunpack.i.h.bf16 %v2971_v2  ;;  %v2972_v33 = vunpack.i.l.bf16 %v2971_v2 }
 0x685   : > { %2394 = vmatprep.subr.bf16.mxu1 %v1961_v15  ;;  %v1691_v39 = vsel %vm317_vm1, %v2952_v10, %v2953_v24 }
 0x686   : > { %2375 = vmatpush3.bf16.msra.mxu0 %v3972_v16  ;;  %2395 = vmatpush3.bf16.msra.mxu1 %v1953_v17  ;;  %v2956_v57 = vpop.permute.xlu0 %2955  ;;  %v1692_v51 = vsel %vm317_vm1, %v2972_v33, %v2973_v20 }
 0x687   : > { %v2976_v21 = vpop.permute.xlu1 %2975  ;;  %v2958_v26 = vunpack.i.h.bf16 %v2956_v57  ;;  %v2957_v11 = vunpack.i.l.bf16 %v2956_v57  ;;  %2396 = vmatprep.subr.bf16.mxu1 %v1962_v31  ;;  %v1948_v37 = vpack.c.bf16 %v1692_v51, %v1691_v39 }
 0x688   : > { %v2978_v7 = vunpack.i.h.bf16 %v2976_v21  ;;  %v2977_v45 = vunpack.i.l.bf16 %v2976_v21 }
 0x689   : > { %v1689_v62 = vsel %vm317_vm1, %v2957_v11, %v2958_v26 }
 0x68a   : > { %2397 = vmatpush3.bf16.msra.mxu1 %v3973_v49  ;;  %v2961_v50 = vpop.permute.xlu0 %2960  ;;  %v1690_v0 = vsel %vm317_vm1, %v2977_v45, %v2978_v7 }
 0x68b   : > { %v2981_v46 = vpop.permute.xlu1 %2980  ;;  %v2963_v28 = vunpack.i.h.bf16 %v2961_v50  ;;  %v2962_v32 = vunpack.i.l.bf16 %v2961_v50  ;;  %v1947_v43 = vpack.c.bf16 %v1690_v0, %v1689_v62 }
 0x68c   : > { %v2983_v25 = vunpack.i.h.bf16 %v2981_v46  ;;  %v2982_v53 = vunpack.i.l.bf16 %v2981_v46 }
 0x68d   : > { %2376 = vmatprep.subr.bf16.mxu0 %v1947_v43  ;;  %v1881_v6 = vsel %vm324_vm3, %v2962_v32, %v2963_v28 }
 0x68e   : > { %2377 = vmatpush3.bf16.msra.mxu0 %v1939_v44  ;;  %v2966_v29 = vpop.permute.xlu0 %2965  ;;  %v1882_v38 = vsel %vm324_vm3, %v2982_v53, %v2983_v25 }
 0x68f   : > { %v2986_v35 = vpop.permute.xlu1 %2985  ;;  %v2968_v4 = vunpack.i.h.bf16 %v2966_v29  ;;  %v2967_v34 = vunpack.i.l.bf16 %v2966_v29  ;;  %2378 = vmatprep.subr.bf16.mxu0 %v1948_v37  ;;  %v1963_v58 = vpack.c.bf16 %v1882_v38, %v1881_v6 }
 0x690   : > { %v2988_v13 = vunpack.i.h.bf16 %v2986_v35  ;;  %v2987_v47 = vunpack.i.l.bf16 %v2986_v35 }
 0x691   : > { %2398 = vmatprep.subr.bf16.mxu1 %v1963_v58  ;;  %v1883_v59 = vsel %vm324_vm3, %v2967_v34, %v2968_v4 }
 0x692   : > { %2379 = vmatpush3.bf16.msra.mxu0 %v3974_v60  ;;  %2399 = vmatpush3.bf16.msra.mxu1 %v1955_v52  ;;  %v2991_v41 = vpop.permute.xlu0 %2990  ;;  %v1884_v63 = vsel %vm324_vm3, %v2987_v47, %v2988_v13 }
 0x693   : > { %v2996_v40 = vpop.permute.xlu1 %2995  ;;  %v2993_v23 = vunpack.i.h.bf16 %v2991_v41  ;;  %v2992_v54 = vunpack.i.l.bf16 %v2991_v41  ;;  %v1964_v42 = vpack.c.bf16 %v1884_v63, %v1883_v59 }
 0x694   : > { %v2998_v19 = vunpack.i.h.bf16 %v2996_v40  ;;  %v2997_v55 = vunpack.i.l.bf16 %v2996_v40 }
 0x695   : > { %v1867_v2 = vsel %vm324_vm3, %v2992_v54, %v2993_v23  ;;  %2059 = vmatmul.mubr.bf16.vlgmr.msra.gmra.mrb[12].mxu0 %v2223_v56  ;;  %2400 = vmatprep.subr.bf16.mxu1 %v1964_v42 }
 0x696   : > { %v1868_v5 = vsel %vm324_vm3, %v2997_v55, %v2998_v19 }
 0x697   : > { %v1956_v15 = vpack.c.bf16 %v1868_v5, %v1867_v2 }
 0x699   : > { %2401 = vmatpush3.bf16.msra.mxu1 %v1956_v15 }
 0x69c   : > { %2099 = vmatmul.mubr.bf16.vlgmr.msra.gmra.mrb[32].mxu1 %v2225_v22 }
 0x6bb   : > { %v2358_v27 = vpop.f32.mrb[8].mxu0 }
 0x6bc   : > { %v2359_v17 = vpop.f32.mrb[9].mxu0 }
 0x6bd   : > { %v2360_v61 = vadd.f32 %v2359_v17, %v2358_v27  ;;  %v2361_v14 = vpop.f32.mrb[10].mxu0 }
 0x6be   : > { %v2362_v31 = vpop.f32.mrb[11].mxu0 }
 0x768   : > { %v2380_v20 = vpop.f32.mrb[12].mxu0 }
 0x769   : > { %v2381_v33 = vpop.f32.mrb[13].mxu0 }
 0x76a   : > { %v2382_v24 = vadd.f32 %v2381_v33, %v2380_v20  ;;  %v2383_v10 = vpop.f32.mrb[14].mxu0 }
 0x76b   : > { %v2384_v16 = vpop.f32.mrb[15].mxu0 }
 0x76c   : > { %v2061_v57 = vadd.f32 %v2382_v24, %v2360_v61 }
 0x76f   : > { %v2402_v18 = vpop.f32.mrb[32].mxu1 }
 0x770   : > { %v2403_v21 = vpop.f32.mrb[33].mxu1 }
 0x771   : > { %v2404_v26 = vadd.f32 %v2403_v21, %v2402_v18  ;;  %v2405_v11 = vpop.f32.mrb[34].mxu1 }
 0x772   : > { %v2406_v12 = vpop.f32.mrb[35].mxu1 }
 0x773   : > { %v2101_v36 = vadd.f32 %v2404_v26, %v2061_v57 }
 0x775   : > { %2106 = vst [vmem:[%s303_s18] sm:$0xff] %v2101_v36 }
 0x776 PF: > { %s18_s27 = sadd.s32 1, %s3030_s27  }
 0x777   : > { %p15_p4 = scmp.ge.s32.totalorder %s18_s27, 4  }
 0x779   :  { %17 = sbr.rel (!%p15_p4) target bundleno = 1 (0x1), region = 82 }

</bundles_post_ra>
